<compile_context>
chip_gen: v7x
topology: tpu7x:2x2x1
jax: 0.10.0
libtpu: 0.0.40
codegen_flags: <defaults>
</compile_context>

<pallas_src>
import functools

import jax
import jax.numpy as jnp
from jax import lax
from jax.experimental import pallas as pl
from jax.experimental.pallas import tpu as pltpu

EPS = 1e-5
LANES = 128


def _round_up(x, m):
    return (x + m - 1) // m * m


def _vmem_params(bytes_needed):
    limit = min(max(2 * int(bytes_needed) + (4 << 20), 32 << 20), 64 << 20)
    return pltpu.CompilerParams(dimension_semantics=("parallel",),
                                vmem_limit_bytes=limit)


# ---------------------------------------------------------------------------
# Pallas kernels
# ---------------------------------------------------------------------------
def _stage1_kernel(xs_ref, w1_ref, wsk_ref,
                   y1_ref, y1s_ref, y1q_ref, ysk_ref, ysks_ref, yskq_ref,
                   *, s, ho, wo, cin_p, cout_p):
    """Per-image: conv1 (3x3, stride s) as ONE K-folded bf16 MXU matmul + fused 1x1 skip conv.

    Emits raw (un-normalized) bf16 conv outputs and per-image f32 sum / sum-of-squares
    partials for the two BatchNorms (one-pass statistics, reduced outside the kernel).
    """
    x = xs_ref[0]                                   # (hs, ws, s*s*cin_p) bf16, packed phases

    taps = []
    for dh in range(3):
        for dw in range(3):
            p = (dh % s) * s + (dw % s)             # stride phase of this tap
            oh, ow = dh // s, dw // s               # spatial offset inside the packed image
            taps.append(x[oh:oh + ho, ow:ow + wo, p * cin_p:(p + 1) * cin_p])

    # im2col-in-VMEM: fold the 9 taps into the matmul reduction dimension.
    slab = jnp.concatenate(taps, axis=-1).reshape(ho * wo, 9 * cin_p)
    acc1 = jnp.dot(slab, w1_ref[...], preferred_element_type=jnp.float32)
    y1_ref[0] = acc1.astype(jnp.bfloat16).reshape(ho, wo, cin_p)
    y1s_ref[0] = jnp.sum(acc1, axis=0, keepdims=True)
    y1q_ref[0] = jnp.sum(acc1 * acc1, axis=0, keepdims=True)

    # Skip branch: 1x1 conv with stride s == the (dh=1, dw=1) tap, already in the slab.
    ctap = slab[:, 4 * cin_p:5 * cin_p]
    accs = jnp.dot(ctap, wsk_ref[...], preferred_element_type=jnp.float32)
    ysk_ref[0] = accs.astype(jnp.bfloat16).reshape(ho, wo, cout_p)
    ysks_ref[0] = jnp.sum(accs, axis=0, keepdims=True)
    yskq_ref[0] = jnp.sum(accs * accs, axis=0, keepdims=True)


def _stage2_kernel(y1_ref, sc1_ref, sh1_ref, w2_ref,
                   y2_ref, y2s_ref, y2q_ref,
                   *, ho, wo, cin_p, cout_p):
    """Per-image: BN1(scale/shift)+ReLU, halo-pad as a value, conv2 (3x3, s=1) K-folded."""
    s1 = sc1_ref[...].reshape(1, 1, cin_p)
    b1 = sh1_ref[...].reshape(1, 1, cin_p)
    a = jnp.maximum(y1_ref[0].astype(jnp.float32) * s1 + b1, 0.0).astype(jnp.bfloat16)

    # Build the spatially padded activation as a value: only the thin halo strips are zeros
    # (no full-buffer zero fill, no full-buffer re-read).
    zrow = jnp.zeros((1, wo + 2, cin_p), jnp.bfloat16)
    zcol = jnp.zeros((ho, 1, cin_p), jnp.bfloat16)
    mid = jnp.concatenate([zcol, a, zcol], axis=1)            # (ho, wo+2, cin_p)
    ap = jnp.concatenate([zrow, mid, zrow], axis=0)           # (ho+2, wo+2, cin_p)

    taps = [ap[dh:dh + ho, dw:dw + wo, :] for dh in range(3) for dw in range(3)]
    slab = jnp.concatenate(taps, axis=-1).reshape(ho * wo, 9 * cin_p)
    acc = jnp.dot(slab, w2_ref[...], preferred_element_type=jnp.float32)
    y2_ref[0] = acc.astype(jnp.bfloat16).reshape(ho, wo, cout_p)
    y2s_ref[0] = jnp.sum(acc, axis=0, keepdims=True)
    y2q_ref[0] = jnp.sum(acc * acc, axis=0, keepdims=True)


def _stage3_kernel(y2_ref, ysk_ref, sc2_ref, sh2_ref, scs_ref, shs_ref, o_ref, *, cout_p):
    """Per-image: BN2+ReLU, BN_skip and the residual add, fused elementwise (bf16 in/out)."""
    s2 = sc2_ref[...].reshape(1, 1, cout_p)
    b2 = sh2_ref[...].reshape(1, 1, cout_p)
    ss = scs_ref[...].reshape(1, 1, cout_p)
    bs = shs_ref[...].reshape(1, 1, cout_p)
    y = jnp.maximum(y2_ref[0].astype(jnp.float32) * s2 + b2, 0.0)
    sk = ysk_ref[0].astype(jnp.float32) * ss + bs
    o_ref[0] = (y + sk).astype(jnp.bfloat16)


# ---------------------------------------------------------------------------
# pallas_call wrappers
# ---------------------------------------------------------------------------
def _stage1_call(xs, w1, wsk, n, hs, ws, ho, wo, s, cin_p, cout_p):
    kern = functools.partial(_stage1_kernel, s=s, ho=ho, wo=wo, cin_p=cin_p, cout_p=cout_p)
    flops = 2 * n * ho * wo * cin_p * (9 * cin_p + cout_p)
    bytes_acc = (xs.size * 2 + w1.size * 2 + wsk.size * 2
                 + n * ho * wo * (cin_p + cout_p) * 2 + 4 * n * (cin_p + cout_p) * 4)
    io_blk = (hs * ws * s * s * cin_p + 9 * cin_p * cin_p + cin_p * cout_p
              + ho * wo * (cin_p + cout_p)) * 2 + 4 * (cin_p + cout_p) * 4
    internal = ho * wo * 9 * cin_p * 2 * 2 + ho * wo * (cin_p + cout_p) * 4
    return pl.pallas_call(
        kern,
        grid=(n,),
        in_specs=[
            pl.BlockSpec((1, hs, ws, s * s * cin_p), lambda i: (i, 0, 0, 0)),
            pl.BlockSpec((9 * cin_p, cin_p), lambda i: (0, 0)),
            pl.BlockSpec((cin_p, cout_p), lambda i: (0, 0)),
        ],
        out_specs=(
            pl.BlockSpec((1, ho, wo, cin_p), lambda i: (i, 0, 0, 0)),
            pl.BlockSpec((1, 1, cin_p), lambda i: (i, 0, 0)),
            pl.BlockSpec((1, 1, cin_p), lambda i: (i, 0, 0)),
            pl.BlockSpec((1, ho, wo, cout_p), lambda i: (i, 0, 0, 0)),
            pl.BlockSpec((1, 1, cout_p), lambda i: (i, 0, 0)),
            pl.BlockSpec((1, 1, cout_p), lambda i: (i, 0, 0)),
        ),
        out_shape=(
            jax.ShapeDtypeStruct((n, ho, wo, cin_p), jnp.bfloat16),
            jax.ShapeDtypeStruct((n, 1, cin_p), jnp.float32),
            jax.ShapeDtypeStruct((n, 1, cin_p), jnp.float32),
            jax.ShapeDtypeStruct((n, ho, wo, cout_p), jnp.bfloat16),
            jax.ShapeDtypeStruct((n, 1, cout_p), jnp.float32),
            jax.ShapeDtypeStruct((n, 1, cout_p), jnp.float32),
        ),
        compiler_params=_vmem_params(2 * io_blk + internal),
        cost_estimate=pl.CostEstimate(flops=flops, transcendentals=0, bytes_accessed=bytes_acc),
    )(xs, w1, wsk)


def _stage2_call(y1, sc1, sh1, w2, n, ho, wo, cin_p, cout_p):
    kern = functools.partial(_stage2_kernel, ho=ho, wo=wo, cin_p=cin_p, cout_p=cout_p)
    flops = 2 * n * ho * wo * 9 * cin_p * cout_p
    bytes_acc = (y1.size * 2 + w2.size * 2
                 + n * ho * wo * cout_p * 2 + 2 * n * cout_p * 4)
    io_blk = (ho * wo * (cin_p + cout_p) + 9 * cin_p * cout_p) * 2 + 4 * cout_p * 4
    internal = (ho + 2) * (wo + 2) * cin_p * 2 + ho * wo * 9 * cin_p * 2 * 2 + ho * wo * cout_p * 4
    return pl.pallas_call(
        kern,
        grid=(n,),
        in_specs=[
            pl.BlockSpec((1, ho, wo, cin_p), lambda i: (i, 0, 0, 0)),
            pl.BlockSpec((1, cin_p), lambda i: (0, 0)),
            pl.BlockSpec((1, cin_p), lambda i: (0, 0)),
            pl.BlockSpec((9 * cin_p, cout_p), lambda i: (0, 0)),
        ],
        out_specs=(
            pl.BlockSpec((1, ho, wo, cout_p), lambda i: (i, 0, 0, 0)),
            pl.BlockSpec((1, 1, cout_p), lambda i: (i, 0, 0)),
            pl.BlockSpec((1, 1, cout_p), lambda i: (i, 0, 0)),
        ),
        out_shape=(
            jax.ShapeDtypeStruct((n, ho, wo, cout_p), jnp.bfloat16),
            jax.ShapeDtypeStruct((n, 1, cout_p), jnp.float32),
            jax.ShapeDtypeStruct((n, 1, cout_p), jnp.float32),
        ),
        compiler_params=_vmem_params(2 * io_blk + internal),
        cost_estimate=pl.CostEstimate(flops=flops, transcendentals=0, bytes_accessed=bytes_acc),
    )(y1, sc1, sh1, w2)


def _stage3_call(y2, ysk, sc2, sh2, scs, shs, n, ho, wo, cout_p):
    kern = functools.partial(_stage3_kernel, cout_p=cout_p)
    img = pl.BlockSpec((1, ho, wo, cout_p), lambda i: (i, 0, 0, 0))
    vec = pl.BlockSpec((1, cout_p), lambda i: (0, 0))
    io_blk = 3 * ho * wo * cout_p * 2 + 4 * cout_p * 4
    return pl.pallas_call(
        kern,
        grid=(n,),
        in_specs=[img, img, vec, vec, vec, vec],
        out_specs=img,
        out_shape=jax.ShapeDtypeStruct((n, ho, wo, cout_p), jnp.bfloat16),
        input_output_aliases={0: 0},                 # write the result over the y2 buffer
        compiler_params=_vmem_params(2 * io_blk),
    )(y2, ysk, sc2, sh2, scs, shs)


# ---------------------------------------------------------------------------
# JAX glue (layout packing + tiny per-channel BN finalization)
# ---------------------------------------------------------------------------
def _pack_input(x_nhwc, cin_p, s):
    """Zero-pad channels to cin_p, spatial 'same' pad by 1, stride-phase pack, cast to bf16."""
    n, h, w, c = x_nhwc.shape
    hp, wp = h + 2, w + 2
    hs, ws = -(-hp // s), -(-wp // s)
    x = jnp.pad(x_nhwc, ((0, 0), (1, hs * s - hp + 1), (1, ws * s - wp + 1), (0, cin_p - c)))
    xs = x.reshape(n, hs, s, ws, s, cin_p)
    xs = xs.transpose(0, 1, 3, 2, 4, 5).reshape(n, hs, ws, s * s * cin_p)
    return xs.astype(jnp.bfloat16)                   # bf16 in HBM; no in-kernel casts


def _pack_w(w_hwio, ci_p, co_p):
    """Pad channels to lane multiples and fold the taps into the K dimension: (KH*KW*Ci_p, Co_p)."""
    kh, kw, ci, co = w_hwio.shape
    w = jnp.pad(w_hwio, ((0, 0), (0, 0), (0, ci_p - ci), (0, co_p - co)))
    return w.reshape(kh * kw * ci_p, co_p).astype(jnp.bfloat16)


def _pad_vec(v, cp):
    return jnp.pad(v, (0, cp - v.shape[0])).reshape(1, cp)


def _bn_scale_shift(s_, q_, count, gamma, beta):
    """Training-mode BN (biased variance) from sum / sum-of-squares partials."""
    mean = s_ / count
    var = jnp.maximum(q_ / count - mean * mean, 0.0)
    scale = gamma * lax.rsqrt(var + EPS)
    shift = beta - mean * scale
    return scale, shift


# ---------------------------------------------------------------------------
# The block (equivalent of ResnetEncSmallBlock.forward, train-mode BN)
# ---------------------------------------------------------------------------
def resnet_enc_small_block(x_nchw, params, stride):
    n, cin, h, w = x_nchw.shape
    cout = params["w_skip"].shape[-1]
    cin_p = _round_up(cin, LANES)
    cout_p = _round_up(cout, LANES)
    ho = (h - 1) // stride + 1
    wo = (w - 1) // stride + 1
    s = stride

    x = jnp.transpose(x_nchw, (0, 2, 3, 1))          # boundary: NCHW -> NHWC
    xs = _pack_input(x, cin_p, s)
    hs, ws = xs.shape[1], xs.shape[2]

    w1 = _pack_w(params["w1"], cin_p, cin_p)         # (9*cin_p, cin_p)  bf16
    w2 = _pack_w(params["w2"], cin_p, cout_p)        # (9*cin_p, cout_p) bf16
    wsk = _pack_w(params["w_skip"], cin_p, cout_p)   # (cin_p, cout_p)   bf16
    # NOTE: conv biases b1/b2/b_skip are dropped — cancelled exactly by train-mode BN.

    y1, y1s, y1q, ysk, ysks, yskq = _stage1_call(
        xs, w1, wsk, n, hs, ws, ho, wo, s, cin_p, cout_p)

    m = n * ho * wo
    sc1, sh1 = _bn_scale_shift(y1s.sum(0), y1q.sum(0), m,
                               _pad_vec(params["g1"], cin_p), _pad_vec(params["beta1"], cin_p))
    scs, shs = _bn_scale_shift(ysks.sum(0), yskq.sum(0), m,
                               _pad_vec(params["g_skip"], cout_p),
                               _pad_vec(params["beta_skip"], cout_p))

    y2, y2s, y2q = _stage2_call(y1, sc1, sh1, w2, n, ho, wo, cin_p, cout_p)
    sc2, sh2 = _bn_scale_shift(y2s.sum(0), y2q.sum(0), m,
                               _pad_vec(params["g2"], cout_p), _pad_vec(params["beta2"], cout_p))

    out = _stage3_call(y2, ysk, sc2, sh2, scs, shs, n, ho, wo, cout_p)
    out = out[..., :cout].astype(jnp.float32)
    return jnp.transpose(out, (0, 3, 1, 2))          # boundary: NHWC -> NCHW


# ---------------------------------------------------------------------------
# Pure-JAX f32 reference (the PyTorch module's forward, train-mode BN)
# ---------------------------------------------------------------------------
def _ref_forward(x, p, stride):
    def conv(x, w, b, s, pad):
        y = lax.conv_general_dilated(x, w, (s, s), [(pad, pad), (pad, pad)],
                                     dimension_numbers=("NCHW", "HWIO", "NCHW"))
        return y + b.reshape(1, -1, 1, 1)

    def bn(x, g, be):
        mean = x.mean(axis=(0, 2, 3), keepdims=True)
        var = jnp.square(x - mean).mean(axis=(0, 2, 3), keepdims=True)
        return g.reshape(1, -1, 1, 1) * (x - mean) * lax.rsqrt(var + EPS) + be.reshape(1, -1, 1, 1)

    y = jnp.maximum(bn(conv(x, p["w1"], p["b1"], stride, 1), p["g1"], p["beta1"]), 0.0)
    y = jnp.maximum(bn(conv(y, p["w2"], p["b2"], 1, 1), p["g2"], p["beta2"]), 0.0)
    s = bn(conv(x, p["w_skip"], p["b_skip"], stride, 0), p["g_skip"], p["beta_skip"])
    return y + s


# ---------------------------------------------------------------------------
def init_params(key, cin, cout):
    ks = jax.random.split(key, 12)
    f32 = jnp.float32
    return {
        # conv weights in HWIO layout (KH, KW, Cin, Cout)
        "w1": 0.2 * jax.random.normal(ks[0], (3, 3, cin, cin), f32),
        "b1": 0.1 * jax.random.normal(ks[1], (cin,), f32),
        "g1": 1.0 + 0.1 * jax.random.normal(ks[2], (cin,), f32),
        "beta1": 0.1 * jax.random.normal(ks[3], (cin,), f32),
        "w2": 0.2 * jax.random.normal(ks[4], (3, 3, cin, cout), f32),
        "b2": 0.1 * jax.random.normal(ks[5], (cout,), f32),
        "g2": 1.0 + 0.1 * jax.random.normal(ks[6], (cout,), f32),
        "beta2": 0.1 * jax.random.normal(ks[7], (cout,), f32),
        "w_skip": 0.2 * jax.random.normal(ks[8], (1, 1, cin, cout), f32),
        "b_skip": 0.1 * jax.random.normal(ks[9], (cout,), f32),
        "g_skip": 1.0 + 0.1 * jax.random.normal(ks[10], (cout,), f32),
        "beta_skip": 0.1 * jax.random.normal(ks[11], (cout,), f32),
    }


if __name__ == "__main__":
    in_channels, out_channels, stride = 4, 8, 2
    key = jax.random.PRNGKey(0)
    kx, kp = jax.random.split(key)
    x = jax.random.normal(kx, (2, in_channels, 16, 16), jnp.float32)   # NCHW, like PyTorch
    params = init_params(kp, in_channels, out_channels)

    fwd = jax.jit(resnet_enc_small_block, static_argnums=2)
    out = jax.block_until_ready(fwd(x, params, stride))

    ref = _ref_forward(x, params, stride)
    assert out.shape == ref.shape == (2, out_channels, 8, 8)
    max_err = float(jnp.max(jnp.abs(out - ref)))
    # bf16 MXU inputs + bf16 HBM intermediates -> bf16-appropriate tolerance vs f32 reference.
    assert jnp.allclose(out, ref, atol=1e-1, rtol=1e-1), f"mismatch vs reference, max err {max_err}"

    print("KERNEL_OK")
</pallas_src>

<mosaic_0001>
module attributes {stable_mosaic.version = 11 : i64} {
  func.func @_stage1_kernel(%arg0: i32, %arg1: memref<1x9x9x512xbf16, #tpu.memory_space<vmem>>, %arg2: memref<1152x128xbf16, #tpu.memory_space<vmem>>, %arg3: memref<128x128xbf16, #tpu.memory_space<vmem>>, %arg4: memref<1x8x8x128xbf16, #tpu.memory_space<vmem>>, %arg5: memref<1x1x128xf32, #tpu.memory_space<vmem>>, %arg6: memref<1x1x128xf32, #tpu.memory_space<vmem>>, %arg7: memref<1x8x8x128xbf16, #tpu.memory_space<vmem>>, %arg8: memref<1x1x128xf32, #tpu.memory_space<vmem>>, %arg9: memref<1x1x128xf32, #tpu.memory_space<vmem>>) attributes {dimension_semantics = [#tpu.dimension_semantics<parallel>], iteration_bounds = array<i64: 2>, scalar_prefetch = 0 : i64, scratch_operands = 0 : i64, tpu.core_type = #tpu.core_type<tc>, window_params = [{transform_indices = @transform_0, window_bounds = array<i64: 1, 9, 9, 512>}, {pipeline_mode = #tpu.pipeline_mode<synchronous>, transform_indices = @transform_1, window_bounds = array<i64: 1152, 128>}, {pipeline_mode = #tpu.pipeline_mode<synchronous>, transform_indices = @transform_2, window_bounds = array<i64: 128, 128>}, {transform_indices = @transform_3, window_bounds = array<i64: 1, 8, 8, 128>}, {transform_indices = @transform_4, window_bounds = array<i64: 1, 1, 128>}, {transform_indices = @transform_5, window_bounds = array<i64: 1, 1, 128>}, {transform_indices = @transform_6, window_bounds = array<i64: 1, 8, 8, 128>}, {transform_indices = @transform_7, window_bounds = array<i64: 1, 1, 128>}, {transform_indices = @transform_8, window_bounds = array<i64: 1, 1, 128>}]} {
    %c0 = arith.constant 0 : index
    %c0_0 = arith.constant 0 : index
    %c0_1 = arith.constant 0 : index
    %c0_2 = arith.constant 0 : index
    %0 = vector.load %arg1[%c0, %c0_0, %c0_1, %c0_2] : memref<1x9x9x512xbf16, #tpu.memory_space<vmem>>, vector<1x9x9x512xbf16>
    %1 = vector.shape_cast %0 : vector<1x9x9x512xbf16> to vector<9x9x512xbf16>
    %2 = vector.extract_strided_slice %1 {offsets = [0, 0, 0], sizes = [8, 8, 128], strides = [1, 1, 1]} : vector<9x9x512xbf16> to vector<8x8x128xbf16>
    %3 = vector.extract_strided_slice %1 {offsets = [0, 0, 128], sizes = [8, 8, 128], strides = [1, 1, 1]} : vector<9x9x512xbf16> to vector<8x8x128xbf16>
    %4 = vector.extract_strided_slice %1 {offsets = [0, 1, 0], sizes = [8, 8, 128], strides = [1, 1, 1]} : vector<9x9x512xbf16> to vector<8x8x128xbf16>
    %5 = vector.extract_strided_slice %1 {offsets = [0, 0, 256], sizes = [8, 8, 128], strides = [1, 1, 1]} : vector<9x9x512xbf16> to vector<8x8x128xbf16>
    %6 = vector.extract_strided_slice %1 {offsets = [0, 0, 384], sizes = [8, 8, 128], strides = [1, 1, 1]} : vector<9x9x512xbf16> to vector<8x8x128xbf16>
    %7 = vector.extract_strided_slice %1 {offsets = [0, 1, 256], sizes = [8, 8, 128], strides = [1, 1, 1]} : vector<9x9x512xbf16> to vector<8x8x128xbf16>
    %8 = vector.extract_strided_slice %1 {offsets = [1, 0, 0], sizes = [8, 8, 128], strides = [1, 1, 1]} : vector<9x9x512xbf16> to vector<8x8x128xbf16>
    %9 = vector.extract_strided_slice %1 {offsets = [1, 0, 128], sizes = [8, 8, 128], strides = [1, 1, 1]} : vector<9x9x512xbf16> to vector<8x8x128xbf16>
    %10 = vector.extract_strided_slice %1 {offsets = [1, 1, 0], sizes = [8, 8, 128], strides = [1, 1, 1]} : vector<9x9x512xbf16> to vector<8x8x128xbf16>
    %11 = tpu.concatenate %2, %3, %4, %5, %6, %7, %8, %9, %10 in 2 : vector<8x8x128xbf16>, vector<8x8x128xbf16>, vector<8x8x128xbf16>, vector<8x8x128xbf16>, vector<8x8x128xbf16>, vector<8x8x128xbf16>, vector<8x8x128xbf16>, vector<8x8x128xbf16>, vector<8x8x128xbf16> -> vector<8x8x1152xbf16>
    %12 = vector.shape_cast %11 : vector<8x8x1152xbf16> to vector<64x1152xbf16>
    %c0_3 = arith.constant 0 : index
    %c0_4 = arith.constant 0 : index
    %13 = vector.load %arg2[%c0_3, %c0_4] : memref<1152x128xbf16, #tpu.memory_space<vmem>>, vector<1152x128xbf16>
    %cst = arith.constant dense<0.000000e+00> : vector<64x128xf32>
    %14 = tpu.matmul %12, %13, %cst {dimension_numbers = #tpu.dot_dimension_numbers<[1], [0], [0], [1], [0, 0, 1, 1], [], []>} : vector<64x1152xbf16>, vector<1152x128xbf16>, vector<64x128xf32> -> vector<64x128xf32>
    %15 = arith.truncf %14 : vector<64x128xf32> to vector<64x128xbf16>
    %16 = vector.shape_cast %15 : vector<64x128xbf16> to vector<8x8x128xbf16>
    %c0_5 = arith.constant 0 : index
    %c0_6 = arith.constant 0 : index
    %c0_7 = arith.constant 0 : index
    %c0_8 = arith.constant 0 : index
    %17 = vector.load %arg4[%c0_5, %c0_6, %c0_7, %c0_8] : memref<1x8x8x128xbf16, #tpu.memory_space<vmem>>, vector<1x8x8x128xbf16>
    %18 = vector.shape_cast %17 : vector<1x8x8x128xbf16> to vector<8x8x128xbf16>
    %19 = vector.shape_cast %16 : vector<8x8x128xbf16> to vector<1x8x8x128xbf16>
    tpu.vector_store %arg4[%c0_5, %c0_6, %c0_7, %c0_8], %19 {strides = array<i32>} : memref<1x8x8x128xbf16, #tpu.memory_space<vmem>>, vector<1x8x8x128xbf16>,
    %cst_9 = arith.constant dense<0.000000e+00> : vector<128xf32>
    %20 = vector.multi_reduction <add>, %14, %cst_9 [0] : vector<64x128xf32> to vector<128xf32>
    %21 = vector.shape_cast %20 : vector<128xf32> to vector<1x128xf32>
    %c0_10 = arith.constant 0 : index
    %c0_11 = arith.constant 0 : index
    %c0_12 = arith.constant 0 : index
    %22 = vector.load %arg5[%c0_10, %c0_11, %c0_12] : memref<1x1x128xf32, #tpu.memory_space<vmem>>, vector<1x1x128xf32>
    %23 = vector.shape_cast %22 : vector<1x1x128xf32> to vector<1x128xf32>
    %24 = vector.shape_cast %21 : vector<1x128xf32> to vector<1x1x128xf32>
    tpu.vector_store %arg5[%c0_10, %c0_11, %c0_12], %24 {strides = array<i32>} : memref<1x1x128xf32, #tpu.memory_space<vmem>>, vector<1x1x128xf32>,
    %25 = arith.mulf %14, %14 : vector<64x128xf32>
    %cst_13 = arith.constant dense<0.000000e+00> : vector<128xf32>
    %26 = vector.multi_reduction <add>, %25, %cst_13 [0] : vector<64x128xf32> to vector<128xf32>
    %27 = vector.shape_cast %26 : vector<128xf32> to vector<1x128xf32>
    %c0_14 = arith.constant 0 : index
    %c0_15 = arith.constant 0 : index
    %c0_16 = arith.constant 0 : index
    %28 = vector.load %arg6[%c0_14, %c0_15, %c0_16] : memref<1x1x128xf32, #tpu.memory_space<vmem>>, vector<1x1x128xf32>
    %29 = vector.shape_cast %28 : vector<1x1x128xf32> to vector<1x128xf32>
    %30 = vector.shape_cast %27 : vector<1x128xf32> to vector<1x1x128xf32>
    tpu.vector_store %arg6[%c0_14, %c0_15, %c0_16], %30 {strides = array<i32>} : memref<1x1x128xf32, #tpu.memory_space<vmem>>, vector<1x1x128xf32>,
    %31 = vector.extract_strided_slice %12 {offsets = [0, 512], sizes = [64, 128], strides = [1, 1]} : vector<64x1152xbf16> to vector<64x128xbf16>
    %c0_17 = arith.constant 0 : index
    %c0_18 = arith.constant 0 : index
    %32 = vector.load %arg3[%c0_17, %c0_18] : memref<128x128xbf16, #tpu.memory_space<vmem>>, vector<128x128xbf16>
    %cst_19 = arith.constant dense<0.000000e+00> : vector<64x128xf32>
    %33 = tpu.matmul %31, %32, %cst_19 {dimension_numbers = #tpu.dot_dimension_numbers<[1], [0], [0], [1], [0, 0, 1, 1], [], []>} : vector<64x128xbf16>, vector<128x128xbf16>, vector<64x128xf32> -> vector<64x128xf32>
    %34 = arith.truncf %33 : vector<64x128xf32> to vector<64x128xbf16>
    %35 = vector.shape_cast %34 : vector<64x128xbf16> to vector<8x8x128xbf16>
    %c0_20 = arith.constant 0 : index
    %c0_21 = arith.constant 0 : index
    %c0_22 = arith.constant 0 : index
    %c0_23 = arith.constant 0 : index
    %36 = vector.load %arg7[%c0_20, %c0_21, %c0_22, %c0_23] : memref<1x8x8x128xbf16, #tpu.memory_space<vmem>>, vector<1x8x8x128xbf16>
    %37 = vector.shape_cast %36 : vector<1x8x8x128xbf16> to vector<8x8x128xbf16>
    %38 = vector.shape_cast %35 : vector<8x8x128xbf16> to vector<1x8x8x128xbf16>
    tpu.vector_store %arg7[%c0_20, %c0_21, %c0_22, %c0_23], %38 {strides = array<i32>} : memref<1x8x8x128xbf16, #tpu.memory_space<vmem>>, vector<1x8x8x128xbf16>,
    %cst_24 = arith.constant dense<0.000000e+00> : vector<128xf32>
    %39 = vector.multi_reduction <add>, %33, %cst_24 [0] : vector<64x128xf32> to vector<128xf32>
    %40 = vector.shape_cast %39 : vector<128xf32> to vector<1x128xf32>
    %c0_25 = arith.constant 0 : index
    %c0_26 = arith.constant 0 : index
    %c0_27 = arith.constant 0 : index
    %41 = vector.load %arg8[%c0_25, %c0_26, %c0_27] : memref<1x1x128xf32, #tpu.memory_space<vmem>>, vector<1x1x128xf32>
    %42 = vector.shape_cast %41 : vector<1x1x128xf32> to vector<1x128xf32>
    %43 = vector.shape_cast %40 : vector<1x128xf32> to vector<1x1x128xf32>
    tpu.vector_store %arg8[%c0_25, %c0_26, %c0_27], %43 {strides = array<i32>} : memref<1x1x128xf32, #tpu.memory_space<vmem>>, vector<1x1x128xf32>,
    %44 = arith.mulf %33, %33 : vector<64x128xf32>
    %cst_28 = arith.constant dense<0.000000e+00> : vector<128xf32>
    %45 = vector.multi_reduction <add>, %44, %cst_28 [0] : vector<64x128xf32> to vector<128xf32>
    %46 = vector.shape_cast %45 : vector<128xf32> to vector<1x128xf32>
    %c0_29 = arith.constant 0 : index
    %c0_30 = arith.constant 0 : index
    %c0_31 = arith.constant 0 : index
    %47 = vector.load %arg9[%c0_29, %c0_30, %c0_31] : memref<1x1x128xf32, #tpu.memory_space<vmem>>, vector<1x1x128xf32>
    %48 = vector.shape_cast %47 : vector<1x1x128xf32> to vector<1x128xf32>
    %49 = vector.shape_cast %46 : vector<1x128xf32> to vector<1x1x128xf32>
    tpu.vector_store %arg9[%c0_29, %c0_30, %c0_31], %49 {strides = array<i32>} : memref<1x1x128xf32, #tpu.memory_space<vmem>>, vector<1x1x128xf32>,
    return
  }
  func.func @transform_0(%arg0: i32) -> (i32, i32, i32, i32) {
    %c0_i32 = arith.constant 0 : i32
    %c0_i32_0 = arith.constant 0 : i32
    %c0_i32_1 = arith.constant 0 : i32
    %c0_i32_2 = arith.constant 0 : i32
    return %arg0, %c0_i32, %c0_i32_0, %c0_i32_1 : i32, i32, i32, i32
  }
  func.func @transform_1(%arg0: i32) -> (i32, i32) {
    %c0_i32 = arith.constant 0 : i32
    %c0_i32_0 = arith.constant 0 : i32
    %c0_i32_1 = arith.constant 0 : i32
    return %c0_i32, %c0_i32_0 : i32, i32
  }
  func.func @transform_2(%arg0: i32) -> (i32, i32) {
    %c0_i32 = arith.constant 0 : i32
    %c0_i32_0 = arith.constant 0 : i32
    %c0_i32_1 = arith.constant 0 : i32
    return %c0_i32, %c0_i32_0 : i32, i32
  }
  func.func @transform_3(%arg0: i32) -> (i32, i32, i32, i32) {
    %c0_i32 = arith.constant 0 : i32
    %c0_i32_0 = arith.constant 0 : i32
    %c0_i32_1 = arith.constant 0 : i32
    %c0_i32_2 = arith.constant 0 : i32
    return %arg0, %c0_i32, %c0_i32_0, %c0_i32_1 : i32, i32, i32, i32
  }
  func.func @transform_4(%arg0: i32) -> (i32, i32, i32) {
    %c0_i32 = arith.constant 0 : i32
    %c0_i32_0 = arith.constant 0 : i32
    %c0_i32_1 = arith.constant 0 : i32
    return %arg0, %c0_i32, %c0_i32_0 : i32, i32, i32
  }
  func.func @transform_5(%arg0: i32) -> (i32, i32, i32) {
    %c0_i32 = arith.constant 0 : i32
    %c0_i32_0 = arith.constant 0 : i32
    %c0_i32_1 = arith.constant 0 : i32
    return %arg0, %c0_i32, %c0_i32_0 : i32, i32, i32
  }
  func.func @transform_6(%arg0: i32) -> (i32, i32, i32, i32) {
    %c0_i32 = arith.constant 0 : i32
    %c0_i32_0 = arith.constant 0 : i32
    %c0_i32_1 = arith.constant 0 : i32
    %c0_i32_2 = arith.constant 0 : i32
    return %arg0, %c0_i32, %c0_i32_0, %c0_i32_1 : i32, i32, i32, i32
  }
  func.func @transform_7(%arg0: i32) -> (i32, i32, i32) {
    %c0_i32 = arith.constant 0 : i32
    %c0_i32_0 = arith.constant 0 : i32
    %c0_i32_1 = arith.constant 0 : i32
    return %arg0, %c0_i32, %c0_i32_0 : i32, i32, i32
  }
  func.func @transform_8(%arg0: i32) -> (i32, i32, i32) {
    %c0_i32 = arith.constant 0 : i32
    %c0_i32_0 = arith.constant 0 : i32
    %c0_i32_1 = arith.constant 0 : i32
    return %arg0, %c0_i32, %c0_i32_0 : i32, i32, i32
  }
}

module attributes {stable_mosaic.version = 11 : i64} {
  func.func @_stage2_kernel(%arg0: i32, %arg1: memref<1x8x8x128xbf16, #tpu.memory_space<vmem>>, %arg2: memref<1x128xf32, #tpu.memory_space<vmem>>, %arg3: memref<1x128xf32, #tpu.memory_space<vmem>>, %arg4: memref<1152x128xbf16, #tpu.memory_space<vmem>>, %arg5: memref<1x8x8x128xbf16, #tpu.memory_space<vmem>>, %arg6: memref<1x1x128xf32, #tpu.memory_space<vmem>>, %arg7: memref<1x1x128xf32, #tpu.memory_space<vmem>>) attributes {dimension_semantics = [#tpu.dimension_semantics<parallel>], iteration_bounds = array<i64: 2>, scalar_prefetch = 0 : i64, scratch_operands = 0 : i64, tpu.core_type = #tpu.core_type<tc>, window_params = [{transform_indices = @transform_0, window_bounds = array<i64: 1, 8, 8, 128>}, {pipeline_mode = #tpu.pipeline_mode<synchronous>, transform_indices = @transform_1, window_bounds = array<i64: 1, 128>}, {pipeline_mode = #tpu.pipeline_mode<synchronous>, transform_indices = @transform_2, window_bounds = array<i64: 1, 128>}, {pipeline_mode = #tpu.pipeline_mode<synchronous>, transform_indices = @transform_3, window_bounds = array<i64: 1152, 128>}, {transform_indices = @transform_4, window_bounds = array<i64: 1, 8, 8, 128>}, {transform_indices = @transform_5, window_bounds = array<i64: 1, 1, 128>}, {transform_indices = @transform_6, window_bounds = array<i64: 1, 1, 128>}]} {
    %c0 = arith.constant 0 : index
    %c0_0 = arith.constant 0 : index
    %0 = vector.load %arg2[%c0, %c0_0] : memref<1x128xf32, #tpu.memory_space<vmem>>, vector<1x128xf32>
    %1 = vector.shape_cast %0 : vector<1x128xf32> to vector<1x1x128xf32>
    %c0_1 = arith.constant 0 : index
    %c0_2 = arith.constant 0 : index
    %2 = vector.load %arg3[%c0_1, %c0_2] : memref<1x128xf32, #tpu.memory_space<vmem>>, vector<1x128xf32>
    %3 = vector.shape_cast %2 : vector<1x128xf32> to vector<1x1x128xf32>
    %c0_3 = arith.constant 0 : index
    %c0_4 = arith.constant 0 : index
    %c0_5 = arith.constant 0 : index
    %c0_6 = arith.constant 0 : index
    %4 = vector.load %arg1[%c0_3, %c0_4, %c0_5, %c0_6] : memref<1x8x8x128xbf16, #tpu.memory_space<vmem>>, vector<1x8x8x128xbf16>
    %5 = vector.shape_cast %4 : vector<1x8x8x128xbf16> to vector<8x8x128xbf16>
    %6 = arith.extf %5 : vector<8x8x128xbf16> to vector<8x8x128xf32>
    %7 = vector.broadcast %1 : vector<1x1x128xf32> to vector<8x8x128xf32>
    %8 = arith.mulf %6, %7 : vector<8x8x128xf32>
    %9 = vector.broadcast %3 : vector<1x1x128xf32> to vector<8x8x128xf32>
    %10 = arith.addf %8, %9 : vector<8x8x128xf32>
    %cst = arith.constant 0.000000e+00 : f32
    %11 = vector.broadcast %cst : f32 to vector<8x8x128xf32>
    %12 = arith.maximumf %10, %11 : vector<8x8x128xf32>
    %13 = arith.truncf %12 : vector<8x8x128xf32> to vector<8x8x128xbf16>
    %cst_7 = arith.constant 0.000000e+00 : bf16
    %14 = vector.broadcast %cst_7 : bf16 to vector<1x10x128xbf16>
    %cst_8 = arith.constant 0.000000e+00 : bf16
    %15 = vector.broadcast %cst_8 : bf16 to vector<8x1x128xbf16>
    %16 = tpu.concatenate %15, %13, %15 in 1 : vector<8x1x128xbf16>, vector<8x8x128xbf16>, vector<8x1x128xbf16> -> vector<8x10x128xbf16>
    %17 = tpu.concatenate %14, %16, %14 in 0 : vector<1x10x128xbf16>, vector<8x10x128xbf16>, vector<1x10x128xbf16> -> vector<10x10x128xbf16>
    %18 = vector.extract_strided_slice %17 {offsets = [0, 0, 0], sizes = [8, 8, 128], strides = [1, 1, 1]} : vector<10x10x128xbf16> to vector<8x8x128xbf16>
    %19 = vector.extract_strided_slice %17 {offsets = [0, 1, 0], sizes = [8, 8, 128], strides = [1, 1, 1]} : vector<10x10x128xbf16> to vector<8x8x128xbf16>
    %20 = vector.extract_strided_slice %17 {offsets = [0, 2, 0], sizes = [8, 8, 128], strides = [1, 1, 1]} : vector<10x10x128xbf16> to vector<8x8x128xbf16>
    %21 = vector.extract_strided_slice %17 {offsets = [1, 0, 0], sizes = [8, 8, 128], strides = [1, 1, 1]} : vector<10x10x128xbf16> to vector<8x8x128xbf16>
    %22 = vector.extract_strided_slice %17 {offsets = [1, 1, 0], sizes = [8, 8, 128], strides = [1, 1, 1]} : vector<10x10x128xbf16> to vector<8x8x128xbf16>
    %23 = vector.extract_strided_slice %17 {offsets = [1, 2, 0], sizes = [8, 8, 128], strides = [1, 1, 1]} : vector<10x10x128xbf16> to vector<8x8x128xbf16>
    %24 = vector.extract_strided_slice %17 {offsets = [2, 0, 0], sizes = [8, 8, 128], strides = [1, 1, 1]} : vector<10x10x128xbf16> to vector<8x8x128xbf16>
    %25 = vector.extract_strided_slice %17 {offsets = [2, 1, 0], sizes = [8, 8, 128], strides = [1, 1, 1]} : vector<10x10x128xbf16> to vector<8x8x128xbf16>
    %26 = vector.extract_strided_slice %17 {offsets = [2, 2, 0], sizes = [8, 8, 128], strides = [1, 1, 1]} : vector<10x10x128xbf16> to vector<8x8x128xbf16>
    %27 = tpu.concatenate %18, %19, %20, %21, %22, %23, %24, %25, %26 in 2 : vector<8x8x128xbf16>, vector<8x8x128xbf16>, vector<8x8x128xbf16>, vector<8x8x128xbf16>, vector<8x8x128xbf16>, vector<8x8x128xbf16>, vector<8x8x128xbf16>, vector<8x8x128xbf16>, vector<8x8x128xbf16> -> vector<8x8x1152xbf16>
    %28 = vector.shape_cast %27 : vector<8x8x1152xbf16> to vector<64x1152xbf16>
    %c0_9 = arith.constant 0 : index
    %c0_10 = arith.constant 0 : index
    %29 = vector.load %arg4[%c0_9, %c0_10] : memref<1152x128xbf16, #tpu.memory_space<vmem>>, vector<1152x128xbf16>
    %cst_11 = arith.constant dense<0.000000e+00> : vector<64x128xf32>
    %30 = tpu.matmul %28, %29, %cst_11 {dimension_numbers = #tpu.dot_dimension_numbers<[1], [0], [0], [1], [0, 0, 1, 1], [], []>} : vector<64x1152xbf16>, vector<1152x128xbf16>, vector<64x128xf32> -> vector<64x128xf32>
    %31 = arith.truncf %30 : vector<64x128xf32> to vector<64x128xbf16>
    %32 = vector.shape_cast %31 : vector<64x128xbf16> to vector<8x8x128xbf16>
    %c0_12 = arith.constant 0 : index
    %c0_13 = arith.constant 0 : index
    %c0_14 = arith.constant 0 : index
    %c0_15 = arith.constant 0 : index
    %33 = vector.load %arg5[%c0_12, %c0_13, %c0_14, %c0_15] : memref<1x8x8x128xbf16, #tpu.memory_space<vmem>>, vector<1x8x8x128xbf16>
    %34 = vector.shape_cast %33 : vector<1x8x8x128xbf16> to vector<8x8x128xbf16>
    %35 = vector.shape_cast %32 : vector<8x8x128xbf16> to vector<1x8x8x128xbf16>
    tpu.vector_store %arg5[%c0_12, %c0_13, %c0_14, %c0_15], %35 {strides = array<i32>} : memref<1x8x8x128xbf16, #tpu.memory_space<vmem>>, vector<1x8x8x128xbf16>,
    %cst_16 = arith.constant dense<0.000000e+00> : vector<128xf32>
    %36 = vector.multi_reduction <add>, %30, %cst_16 [0] : vector<64x128xf32> to vector<128xf32>
    %37 = vector.shape_cast %36 : vector<128xf32> to vector<1x128xf32>
    %c0_17 = arith.constant 0 : index
    %c0_18 = arith.constant 0 : index
    %c0_19 = arith.constant 0 : index
    %38 = vector.load %arg6[%c0_17, %c0_18, %c0_19] : memref<1x1x128xf32, #tpu.memory_space<vmem>>, vector<1x1x128xf32>
    %39 = vector.shape_cast %38 : vector<1x1x128xf32> to vector<1x128xf32>
    %40 = vector.shape_cast %37 : vector<1x128xf32> to vector<1x1x128xf32>
    tpu.vector_store %arg6[%c0_17, %c0_18, %c0_19], %40 {strides = array<i32>} : memref<1x1x128xf32, #tpu.memory_space<vmem>>, vector<1x1x128xf32>,
    %41 = arith.mulf %30, %30 : vector<64x128xf32>
    %cst_20 = arith.constant dense<0.000000e+00> : vector<128xf32>
    %42 = vector.multi_reduction <add>, %41, %cst_20 [0] : vector<64x128xf32> to vector<128xf32>
    %43 = vector.shape_cast %42 : vector<128xf32> to vector<1x128xf32>
    %c0_21 = arith.constant 0 : index
    %c0_22 = arith.constant 0 : index
    %c0_23 = arith.constant 0 : index
    %44 = vector.load %arg7[%c0_21, %c0_22, %c0_23] : memref<1x1x128xf32, #tpu.memory_space<vmem>>, vector<1x1x128xf32>
    %45 = vector.shape_cast %44 : vector<1x1x128xf32> to vector<1x128xf32>
    %46 = vector.shape_cast %43 : vector<1x128xf32> to vector<1x1x128xf32>
    tpu.vector_store %arg7[%c0_21, %c0_22, %c0_23], %46 {strides = array<i32>} : memref<1x1x128xf32, #tpu.memory_space<vmem>>, vector<1x1x128xf32>,
    return
  }
  func.func @transform_0(%arg0: i32) -> (i32, i32, i32, i32) {
    %c0_i32 = arith.constant 0 : i32
    %c0_i32_0 = arith.constant 0 : i32
    %c0_i32_1 = arith.constant 0 : i32
    %c0_i32_2 = arith.constant 0 : i32
    return %arg0, %c0_i32, %c0_i32_0, %c0_i32_1 : i32, i32, i32, i32
  }
  func.func @transform_1(%arg0: i32) -> (i32, i32) {
    %c0_i32 = arith.constant 0 : i32
    %c0_i32_0 = arith.constant 0 : i32
    %c0_i32_1 = arith.constant 0 : i32
    return %c0_i32, %c0_i32_0 : i32, i32
  }
  func.func @transform_2(%arg0: i32) -> (i32, i32) {
    %c0_i32 = arith.constant 0 : i32
    %c0_i32_0 = arith.constant 0 : i32
    %c0_i32_1 = arith.constant 0 : i32
    return %c0_i32, %c0_i32_0 : i32, i32
  }
  func.func @transform_3(%arg0: i32) -> (i32, i32) {
    %c0_i32 = arith.constant 0 : i32
    %c0_i32_0 = arith.constant 0 : i32
    %c0_i32_1 = arith.constant 0 : i32
    return %c0_i32, %c0_i32_0 : i32, i32
  }
  func.func @transform_4(%arg0: i32) -> (i32, i32, i32, i32) {
    %c0_i32 = arith.constant 0 : i32
    %c0_i32_0 = arith.constant 0 : i32
    %c0_i32_1 = arith.constant 0 : i32
    %c0_i32_2 = arith.constant 0 : i32
    return %arg0, %c0_i32, %c0_i32_0, %c0_i32_1 : i32, i32, i32, i32
  }
  func.func @transform_5(%arg0: i32) -> (i32, i32, i32) {
    %c0_i32 = arith.constant 0 : i32
    %c0_i32_0 = arith.constant 0 : i32
    %c0_i32_1 = arith.constant 0 : i32
    return %arg0, %c0_i32, %c0_i32_0 : i32, i32, i32
  }
  func.func @transform_6(%arg0: i32) -> (i32, i32, i32) {
    %c0_i32 = arith.constant 0 : i32
    %c0_i32_0 = arith.constant 0 : i32
    %c0_i32_1 = arith.constant 0 : i32
    return %arg0, %c0_i32, %c0_i32_0 : i32, i32, i32
  }
}

module attributes {stable_mosaic.version = 11 : i64} {
  func.func @_stage3_kernel(%arg0: i32, %arg1: memref<1x8x8x128xbf16, #tpu.memory_space<vmem>>, %arg2: memref<1x8x8x128xbf16, #tpu.memory_space<vmem>>, %arg3: memref<1x128xf32, #tpu.memory_space<vmem>>, %arg4: memref<1x128xf32, #tpu.memory_space<vmem>>, %arg5: memref<1x128xf32, #tpu.memory_space<vmem>>, %arg6: memref<1x128xf32, #tpu.memory_space<vmem>>, %arg7: memref<1x8x8x128xbf16, #tpu.memory_space<vmem>>) attributes {dimension_semantics = [#tpu.dimension_semantics<parallel>], iteration_bounds = array<i64: 2>, scalar_prefetch = 0 : i64, scratch_operands = 0 : i64, tpu.core_type = #tpu.core_type<tc>, window_params = [{transform_indices = @transform_0, window_bounds = array<i64: 1, 8, 8, 128>}, {transform_indices = @transform_1, window_bounds = array<i64: 1, 8, 8, 128>}, {pipeline_mode = #tpu.pipeline_mode<synchronous>, transform_indices = @transform_2, window_bounds = array<i64: 1, 128>}, {pipeline_mode = #tpu.pipeline_mode<synchronous>, transform_indices = @transform_3, window_bounds = array<i64: 1, 128>}, {pipeline_mode = #tpu.pipeline_mode<synchronous>, transform_indices = @transform_4, window_bounds = array<i64: 1, 128>}, {pipeline_mode = #tpu.pipeline_mode<synchronous>, transform_indices = @transform_5, window_bounds = array<i64: 1, 128>}, {transform_indices = @transform_6, window_bounds = array<i64: 1, 8, 8, 128>}]} {
    %c0 = arith.constant 0 : index
    %c0_0 = arith.constant 0 : index
    %0 = vector.load %arg3[%c0, %c0_0] : memref<1x128xf32, #tpu.memory_space<vmem>>, vector<1x128xf32>
    %1 = vector.shape_cast %0 : vector<1x128xf32> to vector<1x1x128xf32>
    %c0_1 = arith.constant 0 : index
    %c0_2 = arith.constant 0 : index
    %2 = vector.load %arg4[%c0_1, %c0_2] : memref<1x128xf32, #tpu.memory_space<vmem>>, vector<1x128xf32>
    %3 = vector.shape_cast %2 : vector<1x128xf32> to vector<1x1x128xf32>
    %c0_3 = arith.constant 0 : index
    %c0_4 = arith.constant 0 : index
    %4 = vector.load %arg5[%c0_3, %c0_4] : memref<1x128xf32, #tpu.memory_space<vmem>>, vector<1x128xf32>
    %5 = vector.shape_cast %4 : vector<1x128xf32> to vector<1x1x128xf32>
    %c0_5 = arith.constant 0 : index
    %c0_6 = arith.constant 0 : index
    %6 = vector.load %arg6[%c0_5, %c0_6] : memref<1x128xf32, #tpu.memory_space<vmem>>, vector<1x128xf32>
    %7 = vector.shape_cast %6 : vector<1x128xf32> to vector<1x1x128xf32>
    %c0_7 = arith.constant 0 : index
    %c0_8 = arith.constant 0 : index
    %c0_9 = arith.constant 0 : index
    %c0_10 = arith.constant 0 : index
    %8 = vector.load %arg1[%c0_7, %c0_8, %c0_9, %c0_10] : memref<1x8x8x128xbf16, #tpu.memory_space<vmem>>, vector<1x8x8x128xbf16>
    %9 = vector.shape_cast %8 : vector<1x8x8x128xbf16> to vector<8x8x128xbf16>
    %10 = arith.extf %9 : vector<8x8x128xbf16> to vector<8x8x128xf32>
    %11 = vector.broadcast %1 : vector<1x1x128xf32> to vector<8x8x128xf32>
    %12 = arith.mulf %10, %11 : vector<8x8x128xf32>
    %13 = vector.broadcast %3 : vector<1x1x128xf32> to vector<8x8x128xf32>
    %14 = arith.addf %12, %13 : vector<8x8x128xf32>
    %cst = arith.constant 0.000000e+00 : f32
    %15 = vector.broadcast %cst : f32 to vector<8x8x128xf32>
    %16 = arith.maximumf %14, %15 : vector<8x8x128xf32>
    %c0_11 = arith.constant 0 : index
    %c0_12 = arith.constant 0 : index
    %c0_13 = arith.constant 0 : index
    %c0_14 = arith.constant 0 : index
    %17 = vector.load %arg2[%c0_11, %c0_12, %c0_13, %c0_14] : memref<1x8x8x128xbf16, #tpu.memory_space<vmem>>, vector<1x8x8x128xbf16>
    %18 = vector.shape_cast %17 : vector<1x8x8x128xbf16> to vector<8x8x128xbf16>
    %19 = arith.extf %18 : vector<8x8x128xbf16> to vector<8x8x128xf32>
    %20 = vector.broadcast %5 : vector<1x1x128xf32> to vector<8x8x128xf32>
    %21 = arith.mulf %19, %20 : vector<8x8x128xf32>
    %22 = vector.broadcast %7 : vector<1x1x128xf32> to vector<8x8x128xf32>
    %23 = arith.addf %21, %22 : vector<8x8x128xf32>
    %24 = arith.addf %16, %23 : vector<8x8x128xf32>
    %25 = arith.truncf %24 : vector<8x8x128xf32> to vector<8x8x128xbf16>
    %c0_15 = arith.constant 0 : index
    %c0_16 = arith.constant 0 : index
    %c0_17 = arith.constant 0 : index
    %c0_18 = arith.constant 0 : index
    %26 = vector.load %arg7[%c0_15, %c0_16, %c0_17, %c0_18] : memref<1x8x8x128xbf16, #tpu.memory_space<vmem>>, vector<1x8x8x128xbf16>
    %27 = vector.shape_cast %26 : vector<1x8x8x128xbf16> to vector<8x8x128xbf16>
    %28 = vector.shape_cast %25 : vector<8x8x128xbf16> to vector<1x8x8x128xbf16>
    tpu.vector_store %arg7[%c0_15, %c0_16, %c0_17, %c0_18], %28 {strides = array<i32>} : memref<1x8x8x128xbf16, #tpu.memory_space<vmem>>, vector<1x8x8x128xbf16>,
    return
  }
  func.func @transform_0(%arg0: i32) -> (i32, i32, i32, i32) {
    %c0_i32 = arith.constant 0 : i32
    %c0_i32_0 = arith.constant 0 : i32
    %c0_i32_1 = arith.constant 0 : i32
    %c0_i32_2 = arith.constant 0 : i32
    return %arg0, %c0_i32, %c0_i32_0, %c0_i32_1 : i32, i32, i32, i32
  }
  func.func @transform_1(%arg0: i32) -> (i32, i32, i32, i32) {
    %c0_i32 = arith.constant 0 : i32
    %c0_i32_0 = arith.constant 0 : i32
    %c0_i32_1 = arith.constant 0 : i32
    %c0_i32_2 = arith.constant 0 : i32
    return %arg0, %c0_i32, %c0_i32_0, %c0_i32_1 : i32, i32, i32, i32
  }
  func.func @transform_2(%arg0: i32) -> (i32, i32) {
    %c0_i32 = arith.constant 0 : i32
    %c0_i32_0 = arith.constant 0 : i32
    %c0_i32_1 = arith.constant 0 : i32
    return %c0_i32, %c0_i32_0 : i32, i32
  }
  func.func @transform_3(%arg0: i32) -> (i32, i32) {
    %c0_i32 = arith.constant 0 : i32
    %c0_i32_0 = arith.constant 0 : i32
    %c0_i32_1 = arith.constant 0 : i32
    return %c0_i32, %c0_i32_0 : i32, i32
  }
  func.func @transform_4(%arg0: i32) -> (i32, i32) {
    %c0_i32 = arith.constant 0 : i32
    %c0_i32_0 = arith.constant 0 : i32
    %c0_i32_1 = arith.constant 0 : i32
    return %c0_i32, %c0_i32_0 : i32, i32
  }
  func.func @transform_5(%arg0: i32) -> (i32, i32) {
    %c0_i32 = arith.constant 0 : i32
    %c0_i32_0 = arith.constant 0 : i32
    %c0_i32_1 = arith.constant 0 : i32
    return %c0_i32, %c0_i32_0 : i32, i32
  }
  func.func @transform_6(%arg0: i32) -> (i32, i32, i32, i32) {
    %c0_i32 = arith.constant 0 : i32
    %c0_i32_0 = arith.constant 0 : i32
    %c0_i32_1 = arith.constant 0 : i32
    %c0_i32_2 = arith.constant 0 : i32
    return %arg0, %c0_i32, %c0_i32_0, %c0_i32_1 : i32, i32, i32, i32
  }
}

</mosaic_0001>

<bundles_post_ra>
// kernel: resnet_enc_small_block.5
= control target key start
LH: loop header
LB: loop body
LE: loop exit
PB: predicated region body
PF: predicated region fallthrough
CT: control target
= control target key end

     0   :  { %s595_s21 = smov 0   ;;  %s638_s0 = inlined_call_operand.vmem [shape: bf16[2,8,8,128], index: 0, kind: input, shape index: {}, may-alias: {0,6}]   ;;  %s639_s1 = inlined_call_operand.vmem [shape: bf16[2,8,8,128], index: 1, kind: input, shape index: {}]   ;;  %s640_s2 = inlined_call_operand.vmem [shape: f32[1,128], index: 2, kind: input, shape index: {}]   ;;  %s641_s3 = inlined_call_operand.vmem [shape: f32[1,128], index: 3, kind: input, shape index: {}]   ;;  %s642_s4 = inlined_call_operand.vmem [shape: f32[1,128], index: 4, kind: input, shape index: {}]   ;;  %s643_s5 = inlined_call_operand.vmem [shape: f32[1,128], index: 5, kind: input, shape index: {}]   ;;  %s644_s6 = inlined_call_operand.vmem [shape: bf16[2,8,8,128], index: 6, kind: output, shape index: {}, may-alias: {0,6}]  }
   0x1 LB: > { %s463_s22 = sadd.s32 4294967295, %s558_s21   ;;  %p467_p0 = scmp.ge.s32.totalorder %s558_s21, 1  ;;  %s558_s21 = sphi %s595_s21, %s16_s21  }
   0x2   : > { %p222_p1 = scmp.lt.s32.totalorder %s558_s21, 3 }
   0x4   : > { %p223_p2 = pnand %p467_p0, %p222_p1 }
   0x5   : > { %p257_p3 = scmp.lt.s32.totalorder (!%p223_p2), %s463_s22, 1  ;;  %v474_v0 = vld [vmem:[%s640_s2] ss:$0 sm:$0xff] (!%p223_p2) }
   0x6   : > { %226 = sbr.rel (%p223_p2) target bundleno = 39 (0x27), region = 44  ;;  %v475_v9 = vld [vmem:[%s641_s3] ss:$0 sm:$0xff] (!%p223_p2) }
   0x7   : > { %v476_v29 = vld [vmem:[%s642_s4] ss:$0 sm:$0xff] (!%p223_p2) }
   0x8   : > { %v477_v39 = vld [vmem:[%s643_s5] ss:$0 sm:$0xff] (!%p223_p2) }
   0xd   : > { %s646_s22 = smov (!%p257_p3, %s463_s22), 1 }
   0xe   : > { %s603_s23 = sshll.u32 %s646_s22, 5 }
   0xf   : > { %s261_s26 = scalar_lea.vmem %s638_s0, %s603_s23  ;;  %s616_s7 = scalar_lea.vmem %s639_s1, %s603_s23 }
  0x10   : > { %v484_v1 = vld [vmem:[%s261_s26] sm:$0xff]   ;;  %v535_v2 = vld [vmem:[%s261_s26 + $0x8] sm:$0xff]   ;;  %v536_v3 = vld [vmem:[%s261_s26 + $0x10] sm:$0xff]   ;;  %s271_s16 = scalar_lea.vmem %s644_s6, %s603_s23 }
  0x11   : > { %v485_v4 = vunpack.c.l.bf16 %v484_v1  ;;  %v486_v5 = vunpack.c.h.bf16 %v484_v1  ;;  %v489_v6 = vunpack.c.l.bf16 %v535_v2  ;;  %v490_v7 = vunpack.c.h.bf16 %v535_v2  ;;  %v537_v8 = vld [vmem:[%s261_s26 + $0x18] sm:$0xff]   ;;  %v500_v22 = vld [vmem:[%s616_s7] sm:$0xff]   ;;  %v538_v27 = vld [vmem:[%s616_s7 + $0x8] sm:$0xff]  }
  0x12   : > { %v493_v10 = vunpack.c.l.bf16 %v536_v3  ;;  %v494_v11 = vunpack.c.h.bf16 %v536_v3  ;;  %v497_v12 = vunpack.c.l.bf16 %v537_v8  ;;  %v498_v13 = vunpack.c.h.bf16 %v537_v8  ;;  %v539_v28 = vld [vmem:[%s616_s7 + $0x10] sm:$0xff]   ;;  %v540_v34 = vld [vmem:[%s616_s7 + $0x18] sm:$0xff]  }
  0x13   : > { %v298_v14 = vmul.f32 %v485_v4, %v474_v0  ;;  %v299_v15 = vmul.f32 %v486_v5, %v474_v0  ;;  %v300_v16 = vmul.f32 %v489_v6, %v474_v0  ;;  %v301_v17 = vmul.f32 %v490_v7, %v474_v0 }
  0x14   : > { %v302_v18 = vmul.f32 %v493_v10, %v474_v0  ;;  %v303_v19 = vmul.f32 %v494_v11, %v474_v0  ;;  %v304_v20 = vmul.f32 %v497_v12, %v474_v0  ;;  %v305_v21 = vmul.f32 %v498_v13, %v474_v0 }
  0x15   : > { %v312_v23 = vadd.f32 %v475_v9, %v298_v14  ;;  %v313_v24 = vadd.f32 %v475_v9, %v299_v15  ;;  %v314_v25 = vadd.f32 %v475_v9, %v300_v16  ;;  %v315_v26 = vadd.f32 %v475_v9, %v301_v17 }
  0x16   : > { %v316_v30 = vadd.f32 %v475_v9, %v302_v18  ;;  %v317_v31 = vadd.f32 %v475_v9, %v303_v19  ;;  %v318_v32 = vadd.f32 %v475_v9, %v304_v20  ;;  %v319_v33 = vadd.f32 %v475_v9, %v305_v21 }
  0x17   : > { %v320_v35 = vmax.f32 %v312_v23, 0.0  ;;  %v321_v36 = vmax.f32 %v313_v24, 0.0  ;;  %v501_v37 = vunpack.c.l.bf16 %v500_v22  ;;  %v502_v38 = vunpack.c.h.bf16 %v500_v22 }
  0x18   : > { %v505_v40 = vunpack.c.l.bf16 %v538_v27  ;;  %v506_v41 = vunpack.c.h.bf16 %v538_v27  ;;  %v509_v42 = vunpack.c.l.bf16 %v539_v28  ;;  %v510_v43 = vunpack.c.h.bf16 %v539_v28 }
  0x19   : > { %v513_v44 = vunpack.c.l.bf16 %v540_v34  ;;  %v514_v45 = vunpack.c.h.bf16 %v540_v34  ;;  %v350_v46 = vmul.f32 %v501_v37, %v476_v29  ;;  %v351_v47 = vmul.f32 %v502_v38, %v476_v29 }
  0x1a   : > { %v352_v48 = vmul.f32 %v505_v40, %v476_v29  ;;  %v353_v49 = vmul.f32 %v506_v41, %v476_v29  ;;  %v354_v50 = vmul.f32 %v509_v42, %v476_v29  ;;  %v355_v51 = vmul.f32 %v510_v43, %v476_v29 }
  0x1b   : > { %v356_v52 = vmul.f32 %v513_v44, %v476_v29  ;;  %v357_v53 = vmul.f32 %v514_v45, %v476_v29  ;;  %v364_v54 = vadd.f32 %v477_v39, %v350_v46  ;;  %v365_v55 = vadd.f32 %v477_v39, %v351_v47 }
  0x1c   : > { %v322_v56 = vmax.f32 %v314_v25, 0.0  ;;  %v323_v57 = vmax.f32 %v315_v26, 0.0  ;;  %v366_v58 = vadd.f32 %v477_v39, %v352_v48  ;;  %v367_v59 = vadd.f32 %v477_v39, %v353_v49 }
  0x1d   : > { %v372_v60 = vadd.f32 %v364_v54, %v320_v35  ;;  %v373_v61 = vadd.f32 %v365_v55, %v321_v36  ;;  %v324_v62 = vmax.f32 %v316_v30, 0.0  ;;  %v325_v63 = vmax.f32 %v317_v31, 0.0 }
  0x1e   : > { %v374_v0 = vadd.f32 %v366_v58, %v322_v56  ;;  %v375_v1 = vadd.f32 %v367_v59, %v323_v57  ;;  %v368_v2 = vadd.f32 %v477_v39, %v354_v50  ;;  %v369_v3 = vadd.f32 %v477_v39, %v355_v51 }
  0x1f   : > { %v518_v4 = vpack.c.bf16 %v373_v61, %v372_v60  ;;  %v326_v5 = vmax.f32 %v318_v32, 0.0  ;;  %v327_v6 = vmax.f32 %v319_v33, 0.0  ;;  %v370_v7 = vadd.f32 %v477_v39, %v356_v52 }
  0x20   : > { %v523_v8 = vpack.c.bf16 %v375_v1, %v374_v0  ;;  %v376_v9 = vadd.f32 %v368_v2, %v324_v62  ;;  %v377_v10 = vadd.f32 %v369_v3, %v325_v63  ;;  %v371_v11 = vadd.f32 %v477_v39, %v357_v53 }
  0x21   : > { %519 = vst [vmem:[%s271_s16] sm:$0xff] %v518_v4   ;;  %v378_v12 = vadd.f32 %v370_v7, %v326_v5 }
  0x22   : > { %541 = vst [vmem:[%s271_s16 + $0x8] sm:$0xff] %v523_v8   ;;  %v528_v13 = vpack.c.bf16 %v377_v10, %v376_v9  ;;  %v379_v14 = vadd.f32 %v371_v11, %v327_v6 }
  0x24   : > { %542 = vst [vmem:[%s271_s16 + $0x10] sm:$0xff] %v528_v13   ;;  %v533_v15 = vpack.c.bf16 %v379_v14, %v378_v12 }
  0x26   : > { %543 = vst [vmem:[%s271_s16 + $0x18] sm:$0xff] %v533_v15  }
  0x27 PF: > { %s16_s21 = sadd.s32 1, %s558_s21  }
  0x28   : > { %p13_p4 = scmp.ge.s32.totalorder %s16_s21, 4  }
  0x2a   :  { %15 = sbr.rel (!%p13_p4) target bundleno = 1 (0x1), region = 77 }

// kernel: resnet_enc_small_block.3
= control target key start
LH: loop header
LB: loop body
LE: loop exit
PB: predicated region body
PF: predicated region fallthrough
CT: control target
= control target key end

     0   :  { %s2682_s27 = smov 0   ;;  %s3159_s0 = inlined_call_operand.vmem [shape: bf16[2,9,9,512], index: 0, kind: input, shape index: {}]   ;;  %s3160_s1 = inlined_call_operand.vmem [shape: bf16[1152,128], index: 1, kind: input, shape index: {}]   ;;  %s3161_s2 = inlined_call_operand.vmem [shape: bf16[128,128], index: 2, kind: input, shape index: {}]   ;;  %s3162_s3 = inlined_call_operand.vmem [shape: bf16[2,8,8,128], index: 3, kind: output, shape index: {0}]   ;;  %s3163_s4 = inlined_call_operand.vmem [shape: f32[2,1,128], index: 4, kind: output, shape index: {1}]   ;;  %s3164_s5 = inlined_call_operand.vmem [shape: f32[2,1,128], index: 5, kind: output, shape index: {2}]   ;;  %s3165_s6 = inlined_call_operand.vmem [shape: bf16[2,8,8,128], index: 6, kind: output, shape index: {3}]   ;;  %s3166_s7 = inlined_call_operand.vmem [shape: f32[2,1,128], index: 7, kind: output, shape index: {4}]   ;;  %s3167_s8 = inlined_call_operand.vmem [shape: f32[2,1,128], index: 8, kind: output, shape index: {5}]  }
   0x1 LB: > { %s2066_s28 = sadd.s32 4294967295, %s2635_s27   ;;  %p2070_p0 = scmp.ge.s32.totalorder %s2635_s27, 1  ;;  %s2635_s27 = sphi %s2682_s27, %s19_s27  }
   0x2   : > { %p273_p1 = scmp.lt.s32.totalorder %s2635_s27, 3 }
   0x4   : > { %p274_p2 = pnand %p2070_p0, %p273_p1 }
   0x5   : > { %v2532_v0 = vld [vmem:[%s3160_s1 + $0x40] sm:$0xff] (!%p274_p2)   ;;  %v2536_v4 = vld [vmem:[%s3160_s1 + $0x48] sm:$0xff] (!%p274_p2)   ;;  %v2540_v8 = vld [vmem:[%s3160_s1 + $0x50] sm:$0xff] (!%p274_p2)   ;;  %p324_p3 = scmp.lt.s32.totalorder (!%p274_p2), %s2066_s28, 1 }
   0x6   : > { %277 = sbr.rel (%p274_p2) target bundleno = 351 (0x15f), region = 32  ;;  %v2533_v1 = vld [vmem:[%s3160_s1 + $0xc0] sm:$0xff] (!%p274_p2)   ;;  %2291 = vmatprep.subr.bf16.mxu0 (!%p274_p2), %v2532_v0  ;;  %v2537_v5 = vld [vmem:[%s3160_s1 + $0xc8] sm:$0xff] (!%p274_p2)   ;;  %v2541_v9 = vld [vmem:[%s3160_s1 + $0xd0] sm:$0xff] (!%p274_p2)  }
   0x7   : > { %v2534_v2 = vld [vmem:[%s3160_s1] sm:$0xff] (!%p274_p2)   ;;  %2331 = vmatprep.subr.bf16.mxu1 (!%p274_p2), %v2533_v1  ;;  %v2538_v6 = vld [vmem:[%s3160_s1 + $0x8] sm:$0xff] (!%p274_p2)   ;;  %v2542_v10 = vld [vmem:[%s3160_s1 + $0x10] sm:$0xff] (!%p274_p2)  }
   0x8   : > { %v2535_v3 = vld [vmem:[%s3160_s1 + $0x80] sm:$0xff] (!%p274_p2)   ;;  %2292 = vmatpush3.bf16.msra.mxu0 (!%p274_p2), %v2534_v2  ;;  %v2539_v7 = vld [vmem:[%s3160_s1 + $0x88] sm:$0xff] (!%p274_p2)   ;;  %v2543_v11 = vld [vmem:[%s3160_s1 + $0x90] sm:$0xff] (!%p274_p2)  }
   0x9   : > { %2332 = vmatpush3.bf16.msra.mxu1 (!%p274_p2), %v2535_v3  ;;  %2293 = vmatprep.subr.bf16.mxu0 (!%p274_p2), %v2536_v4  ;;  %v2544_v12 = vld [vmem:[%s3160_s1 + $0x58] sm:$0xff] (!%p274_p2)   ;;  %v2548_v16 = vld [vmem:[%s3160_s1 + $0x60] sm:$0xff] (!%p274_p2)   ;;  %v2552_v20 = vld [vmem:[%s3160_s1 + $0x68] sm:$0xff] (!%p274_p2)  }
   0xa   : > { %2333 = vmatprep.subr.bf16.mxu1 (!%p274_p2), %v2537_v5  ;;  %v2545_v13 = vld [vmem:[%s3160_s1 + $0xd8] sm:$0xff] (!%p274_p2)   ;;  %v2549_v17 = vld [vmem:[%s3160_s1 + $0xe0] sm:$0xff] (!%p274_p2)   ;;  %v2553_v21 = vld [vmem:[%s3160_s1 + $0xe8] sm:$0xff] (!%p274_p2)  }
   0xb   : > { %v2546_v14 = vld [vmem:[%s3160_s1 + $0x18] sm:$0xff] (!%p274_p2)   ;;  %v2550_v18 = vld [vmem:[%s3160_s1 + $0x20] sm:$0xff] (!%p274_p2)   ;;  %v2554_v22 = vld [vmem:[%s3160_s1 + $0x28] sm:$0xff] (!%p274_p2)  }
   0xc   : > { %2294 = vmatpush3.bf16.msra.mxu0 (!%p274_p2), %v2538_v6  ;;  %v2547_v15 = vld [vmem:[%s3160_s1 + $0x98] sm:$0xff] (!%p274_p2)   ;;  %v2551_v19 = vld [vmem:[%s3160_s1 + $0xa0] sm:$0xff] (!%p274_p2)   ;;  %v2555_v23 = vld [vmem:[%s3160_s1 + $0xa8] sm:$0xff] (!%p274_p2)  }
   0xd   : > { %2334 = vmatpush3.bf16.msra.mxu1 %v2539_v7  ;;  %2295 = vmatprep.subr.bf16.mxu0 %v2540_v8  ;;  %s3169_s28 = smov (!%p324_p3, %s2066_s28), 1  ;;  %v2556_v24 = vld [vmem:[%s3160_s1 + $0x70] sm:$0xff]   ;;  %v2560_v28 = vld [vmem:[%s3160_s1 + $0x78] sm:$0xff]   ;;  %v2568_v44 = vld [vmem:[%s3160_s1 + $0x140] sm:$0xff]  }
   0xe   : > { %2335 = vmatprep.subr.bf16.mxu1 %v2541_v9  ;;  %v2557_v25 = vld [vmem:[%s3160_s1 + $0xf0] sm:$0xff]   ;;  %s2523_s19 = smul.u32 288, %s3169_s28  ;;  %v2561_v29 = vld [vmem:[%s3160_s1 + $0xf8] sm:$0xff]   ;;  %v2569_v45 = vld [vmem:[%s3160_s1 + $0x1c0] sm:$0xff]   ;;  %s2227_s15 = sshll.u32 %s3169_s28, 5 }
   0xf   : > { %v2558_v26 = vld [vmem:[%s3160_s1 + $0x30] sm:$0xff]   ;;  %v2562_v30 = vld [vmem:[%s3160_s1 + $0x38] sm:$0xff]   ;;  %v2570_v51 = vld [vmem:[%s3160_s1 + $0x100] sm:$0xff]   ;;  %s3125_s18 = scalar_lea.vmem %s3162_s3, %s2227_s15  ;;  %s3131_s21 = scalar_lea.vmem %s3165_s6, %s2227_s15 }
  0x10   : > { %2296 = vmatpush3.bf16.msra.mxu0 %v2542_v10  ;;  %v2559_v27 = vld [vmem:[%s3160_s1 + $0xb0] sm:$0xff]   ;;  %s2790_s10 = scalar_lea.vmem %s3159_s0, %s2523_s19  ;;  %v2563_v31 = vld [vmem:[%s3160_s1 + $0xb8] sm:$0xff]   ;;  %v2572_v52 = vld [vmem:[%s3160_s1 + $0x148] sm:$0xff]   ;;  %s336_s24 = scalar_lea.vmem %s3163_s4, %s3169_s28 }
  0x11   : > { %2336 = vmatpush3.bf16.msra.mxu1 %v2543_v11  ;;  %2297 = vmatprep.subr.bf16.mxu0 %v2544_v12  ;;  %v352_v32 = vld [vmem:[%s2790_s10] sm:$0xff]  ;;  %v354_v33 = vld [vmem:[%s2790_s10 + $0x10] sm:$0x11]  ;;  %v2805_v37 = vld [vmem:[%s2790_s10 + $0x8] sm:$0xff]  ;;  %s339_s29 = scalar_lea.vmem %s3164_s5, %s3169_s28  ;;  %s347_s9 = scalar_lea.vmem %s3166_s7, %s3169_s28 }
  0x12   : > { %2337 = vmatprep.subr.bf16.mxu1 %v2545_v13  ;;  %v2801_v34 = vld [vmem:[%s2790_s10 + $0x20] sm:$0xff]  ;;  %v2076_v35 = vcombine.low %v352_v32, %v354_v33  ;;  %v2808_v38 = vld [vmem:[%s2790_s10 + $0x28] sm:$0xff]  ;;  %v358_v41 = vld [vmem:[%s2790_s10 + $0x30] sm:$0x11]  ;;  %s350_s13 = scalar_lea.vmem %s3167_s8, %s3169_s28 }
  0x13   : > { %v2094_v36 = vcombine.high %v352_v32, %v2801_v34  ;;  %v2093_v39 = vcombine.low %v352_v32, %v2801_v34  ;;  %v2096_v40 = vcombine.low %v2805_v37, %v2808_v38  ;;  %v2077_v43 = vcombine.low %v2801_v34, %v358_v41  ;;  %v355_v48 = vld [vmem:[%s2790_s10 + $0x18] sm:$0x11]  ;;  %v2574_v56 = vld [vmem:[%s3160_s1 + $0x108] sm:$0xff]   ;;  %v2571_v59 = vld [vmem:[%s3160_s1 + $0x180] sm:$0xff]  }
  0x14   : > { %2298 = vmatpush3.bf16.msra.mxu0 %v2546_v14  ;;  %v437_v42 = vshll.u32 %v2076_v35, 16  ;;  %v435_v46 = vshrl.u32 %v2076_v35, 16  ;;  %v359_v57 = vld [vmem:[%s2790_s10 + $0x38] sm:$0x11]  ;;  %v2835_v58 = vcombine.low %v2805_v37, %v355_v48  ;;  %v2841_v60 = vld [vmem:[%s2790_s10 + $0x40] sm:$0xff]  ;;  %v2573_v62 = vld [vmem:[%s3160_s1 + $0x1c8] sm:$0xff]  }
  0x15   : > { %2338 = vmatpush3.bf16.msra.mxu1 %v2547_v15  ;;  %2299 = vmatprep.subr.bf16.mxu0 %v2548_v16  ;;  %v442_v49 = vshrl.u32 %v2077_v43, 16  ;;  %v444_v50 = vshll.u32 %v2077_v43, 16  ;;  %v2848_v63 = vld [vmem:[%s2790_s10 + $0x60] sm:$0xff]  ;;  %v2851_v0 = vld [vmem:[%s2790_s10 + $0x48] sm:$0xff]  ;;  %v362_v5 = vld [vmem:[%s2790_s10 + $0x50] sm:$0x11]  ;;  %v2874_v12 = vcombine.low %v2808_v38, %v359_v57 }
  0x16   : > { %2339 = vmatprep.subr.bf16.mxu1 %v2549_v17  ;;  %1304 = vmatprep.mubr.bf16.mxu0 %v2094_v36  ;;  %v439_v47 = vrot.slane %v437_v42, 1  ;;  %v2575_v1 = vld [vmem:[%s3160_s1 + $0x188] sm:$0xff]   ;;  %v2103_v2 = vcombine.high %v2841_v60, %v2848_v63  ;;  %v2102_v4 = vcombine.low %v2841_v60, %v2848_v63  ;;  %v366_v7 = vld [vmem:[%s2790_s10 + $0x70] sm:$0x11]  ;;  %v2078_v8 = vcombine.low %v2841_v60, %v362_v5  ;;  %v363_v17 = vld [vmem:[%s2790_s10 + $0x58] sm:$0x11] }
  0x17   : > { %1369 = vmatprep.mubr.bf16.mxu1 %v2096_v40  ;;  %v446_v54 = vrot.slane %v444_v50, 1  ;;  %v2859_v3 = vld [vmem:[%s2790_s10 + $0x68] sm:$0xff]  ;;  %v541_v9 = vshll.u32 %v2835_v58, 16  ;;  %v2079_v10 = vcombine.low %v2848_v63, %v366_v7  ;;  %v2580_v11 = vld [vmem:[%s3160_s1 + $0x150] sm:$0xff]   ;;  %v546_v33 = vshrl.u32 %v2874_v12, 16  ;;  %v2587_v36 = vld [vmem:[%s3160_s1 + $0x198] sm:$0xff]  }
  0x18   : > { %2300 = vmatpush3.bf16.msra.mxu0 %v2550_v18  ;;  %v440_v53 = vor.u32 %v439_v47, %v435_v46  ;;  %v2105_v6 = vcombine.low %v2851_v0, %v2859_v3  ;;  %v449_v13 = vshrl.u32 %v2078_v8, 16  ;;  %v451_v14 = vshll.u32 %v2078_v8, 16  ;;  %v2581_v15 = vld [vmem:[%s3160_s1 + $0x1d0] sm:$0xff]   ;;  %v2917_v40 = vld [vmem:[%s2790_s10 + $0x88] sm:$0xff]  ;;  %v367_v42 = vld [vmem:[%s2790_s10 + $0x78] sm:$0x11] }
  0x19   : > { %2340 = vmatpush3.bf16.msra.mxu1 %v2551_v19  ;;  %2301 = vmatprep.subr.bf16.mxu0 %v2552_v20  ;;  %v2828_v55 = vor.u32 %v446_v54, %v442_v49  ;;  %v2582_v16 = vld [vmem:[%s3160_s1 + $0x110] sm:$0xff]   ;;  %v456_v18 = vshrl.u32 %v2079_v10, 16  ;;  %v458_v19 = vshll.u32 %v2079_v10, 16  ;;  %v543_v32 = vrot.slane %v541_v9, 1  ;;  %v2593_v57 = vld [vmem:[%s3160_s1 + $0x1e0] sm:$0xff]   ;;  %v2596_v5 = vld [vmem:[%s3160_s1 + $0x168] sm:$0xff]  }
  0x1a   : > { %2341 = vmatprep.subr.bf16.mxu1 %v2553_v21  ;;  %v453_v20 = vrot.slane %v451_v14, 1  ;;  %v2583_v21 = vld [vmem:[%s3160_s1 + $0x190] sm:$0xff]   ;;  %v2597_v7 = vld [vmem:[%s3160_s1 + $0x1e8] sm:$0xff]  }
  0x1b   : > { %v2095_v61 = vcombine.low %v440_v53, %v2828_v55  ;;  %v370_v46 = vld [vmem:[%s2790_s10 + $0x90] sm:$0x11]  ;;  %v2938_v53 = vcombine.low %v2859_v3, %v367_v42  ;;  %v2599_v14 = vld [vmem:[%s3160_s1 + $0x1a8] sm:$0xff]  }
  0x1c   : > { %2302 = vmatpush3.bf16.msra.mxu0 %v2554_v22  ;;  %v460_v22 = vrot.slane %v458_v19, 1  ;;  %v374_v48 = vld [vmem:[%s2790_s10 + $0xb0] sm:$0x11] }
  0x1d   : > { %2342 = vmatpush3.bf16.msra.mxu1 %v2555_v23  ;;  %2303 = vmatprep.subr.bf16.mxu0 %v2556_v24  ;;  %v2584_v23 = vld [vmem:[%s3160_s1 + $0x158] sm:$0xff]   ;;  %v548_v24 = vshll.u32 %v2874_v12, 16  ;;  %v562_v10 = vshll.u32 %v2938_v53, 16  ;;  %v2598_v12 = vld [vmem:[%s3160_s1 + $0x128] sm:$0xff]  }
  0x1e   : > { %2343 = vmatprep.subr.bf16.mxu1 %v2557_v25  ;;  %v2890_v25 = vor.u32 %v453_v20, %v449_v13 }
  0x1f   : > { %v550_v41 = vrot.slane %v548_v24, 1  ;;  %v2987_v24 = vld [vmem:[%s2790_s10 + $0xe8] sm:$0xff] }
  0x20   : > { %2304 = vmatpush3.bf16.msra.mxu0 %v2558_v26  ;;  %v2585_v26 = vld [vmem:[%s3160_s1 + $0x1d8] sm:$0xff]  }
  0x21   : > { %2344 = vmatpush3.bf16.msra.mxu1 %v2559_v27  ;;  %2305 = vmatprep.subr.bf16.mxu0 %v2560_v28  ;;  %v2895_v27 = vor.u32 %v460_v22, %v456_v18  ;;  %v2586_v28 = vld [vmem:[%s3160_s1 + $0x118] sm:$0xff]   ;;  %v551_v9 = vor.u32 %v550_v41, %v546_v33  ;;  %v2979_v18 = vld [vmem:[%s2790_s10 + $0xc8] sm:$0xff]  ;;  %v382_v33 = vld [vmem:[%s2790_s10 + $0xf0] sm:$0x11] }
  0x22   : > { %2345 = vmatprep.subr.bf16.mxu1 %v2561_v29  ;;  %v2901_v29 = vcombine.low %v2851_v0, %v363_v17  ;;  %v2976_v17 = vld [vmem:[%s2790_s10 + $0xe0] sm:$0xff]  ;;  %v375_v22 = vld [vmem:[%s2790_s10 + $0xb8] sm:$0x11]  ;;  %v2604_v41 = vld [vmem:[%s3160_s1 + $0x170] sm:$0xff]  }
  0x23   : > { %v2104_v35 = vcombine.low %v2890_v25, %v2895_v27 }
  0x24   : > { %2306 = vmatpush3.bf16.msra.mxu0 %v2562_v30  ;;  %v2904_v30 = vld [vmem:[%s2790_s10 + $0x80] sm:$0xff]  ;;  %v553_v19 = vshrl.u32 %v2901_v29, 16 }
  0x25   : > { %2346 = vmatpush3.bf16.msra.mxu1 %v2563_v31  ;;  %2371 = vmatprep.subr.bf16.mxu0 %v2568_v44  ;;  %v539_v31 = vshrl.u32 %v2835_v58, 16  ;;  %v2923_v44 = vld [vmem:[%s2790_s10 + $0xa8] sm:$0xff]  ;;  %v2080_v49 = vcombine.low %v2904_v30, %v370_v46  ;;  %v2594_v58 = vld [vmem:[%s3160_s1 + $0x120] sm:$0xff]  }
  0x26   : > { %2411 = vmatprep.subr.bf16.mxu1 %v2569_v45  ;;  %v2114_v47 = vcombine.low %v2917_v40, %v2923_v44 }
  0x27   : > { %1305 = vmatmul.mubr.bf16.vlgmr.msra.gmra.mrb[0].mxu0 %v2093_v39  ;;  %v2914_v39 = vld [vmem:[%s2790_s10 + $0xa0] sm:$0xff]  ;;  %v463_v54 = vshrl.u32 %v2080_v49, 16  ;;  %v544_v8 = vor.u32 %v543_v32, %v539_v31  ;;  %v564_v32 = vrot.slane %v562_v10, 1 }
  0x28   : > { %2372 = vmatpush3.bf16.msra.mxu0 %v2570_v51  ;;  %1370 = vmatmul.mubr.bf16.vlgmr.msra.gmra.mrb[0].mxu1 %v2095_v61  ;;  %v2112_v43 = vcombine.high %v2904_v30, %v2914_v39  ;;  %v2111_v45 = vcombine.low %v2904_v30, %v2914_v39  ;;  %v2081_v50 = vcombine.low %v2914_v39, %v374_v48  ;;  %v2592_v51 = vld [vmem:[%s3160_s1 + $0x160] sm:$0xff]   ;;  %v2606_v48 = vld [vmem:[%s3160_s1 + $0x130] sm:$0xff]  }
  0x29   : > { %2373 = vmatprep.subr.bf16.mxu0 %v2572_v52  ;;  %2412 = vmatpush3.bf16.msra.mxu1 %v2571_v59  ;;  %v555_v52 = vshll.u32 %v2901_v29, 16  ;;  %v371_v59 = vld [vmem:[%s2790_s10 + $0x98] sm:$0x11]  ;;  %v2098_v31 = vcombine.low %v544_v8, %v551_v9  ;;  %v2123_v29 = vcombine.low %v2979_v18, %v2987_v24  ;;  %v2100_v9 = vcombine.high %v2801_v34, %v2841_v60 }
  0x2a   : > { %1312 = vmatprep.mubr.bf16.mxu0 %v2103_v2  ;;  %2413 = vmatprep.subr.bf16.mxu1 %v2573_v62  ;;  %v470_v61 = vshrl.u32 %v2081_v50, 16  ;;  %v472_v62 = vshll.u32 %v2081_v50, 16  ;;  %v2595_v2 = vld [vmem:[%s3160_s1 + $0x1a0] sm:$0xff]   ;;  %v2965_v13 = vcombine.low %v2917_v40, %v371_v59  ;;  %v2609_v59 = vld [vmem:[%s3160_s1 + $0x1f8] sm:$0xff]  }
  0x2b   : > { %1377 = vmatprep.mubr.bf16.mxu1 %v2105_v6  ;;  %v557_v20 = vrot.slane %v555_v52, 1  ;;  %v2611_v8 = vld [vmem:[%s3160_s1 + $0x1b8] sm:$0xff]  }
  0x2c   : > { %2374 = vmatpush3.bf16.msra.mxu0 %v2574_v56  ;;  %v465_v56 = vshll.u32 %v2080_v49, 16  ;;  %v569_v42 = vshll.u32 %v2965_v13, 16 }
  0x2d   : > { %2375 = vmatprep.subr.bf16.mxu0 %v2580_v11  ;;  %2414 = vmatpush3.bf16.msra.mxu1 %v2575_v1 }
  0x2e   : > { %2415 = vmatprep.subr.bf16.mxu1 %v2581_v15  ;;  %v467_v1 = vrot.slane %v465_v56, 1  ;;  %v2971_v15 = vld [vmem:[%s2790_s10 + $0xc0] sm:$0xff] }
  0x2f   : > { %1313 = vmatmul.mubr.bf16.gmra.mrb[4].mxu0 %v2102_v4  ;;  %v474_v4 = vrot.slane %v472_v62, 1 }
  0x30   : > { %2376 = vmatpush3.bf16.msra.mxu0 %v2582_v16  ;;  %1378 = vmatmul.mubr.bf16.gmra.mrb[4].mxu1 %v2104_v35  ;;  %v2953_v6 = vor.u32 %v467_v1, %v463_v54  ;;  %v383_v54 = vld [vmem:[%s2790_s10 + $0xf8] sm:$0x11] }
  0x31   : > { %2377 = vmatprep.subr.bf16.mxu0 %v2584_v23  ;;  %2416 = vmatpush3.bf16.msra.mxu1 %v2583_v21  ;;  %v2959_v11 = vor.u32 %v474_v4, %v470_v61  ;;  %v560_v21 = vshrl.u32 %v2938_v53, 16  ;;  %v2121_v23 = vcombine.high %v2971_v15, %v2976_v17  ;;  %v2607_v53 = vld [vmem:[%s3160_s1 + $0x1b0] sm:$0xff]   ;;  %v558_v61 = vor.u32 %v557_v20, %v553_v19  ;;  %v2610_v4 = vld [vmem:[%s3160_s1 + $0x138] sm:$0xff]  }
  0x32   : > { %2417 = vmatprep.subr.bf16.mxu1 %v2585_v26  ;;  %1320 = vmatprep.mubr.bf16.mxu0 %v2112_v43  ;;  %v2120_v26 = vcombine.low %v2971_v15, %v2976_v17  ;;  %v2089_v43 = vcombine.low %v2923_v44, %v375_v22 }
  0x33   : > { %1385 = vmatprep.mubr.bf16.mxu1 %v2114_v47  ;;  %v2113_v16 = vcombine.low %v2953_v6, %v2959_v11  ;;  %v2605_v47 = vld [vmem:[%s3160_s1 + $0x1f0] sm:$0xff]   ;;  %v565_v62 = vor.u32 %v564_v32, %v560_v21  ;;  %v2614_v21 = vld [vmem:[%s3160_s1 + $0x208] sm:$0xff]   ;;  %v2099_v32 = vcombine.low %v2801_v34, %v2841_v60  ;;  %v2618_v34 = vld [vmem:[%s3160_s1 + $0x218] sm:$0xff]  }
  0x34   : > { %2378 = vmatpush3.bf16.msra.mxu0 %v2586_v28  ;;  %v378_v28 = vld [vmem:[%s2790_s10 + $0xd0] sm:$0x11]  ;;  %v576_v1 = vshll.u32 %v2089_v43, 16  ;;  %v574_v10 = vshrl.u32 %v2089_v43, 16 }
  0x35   : > { %2418 = vmatpush3.bf16.msra.mxu1 %v2587_v36  ;;  %2379 = vmatprep.subr.bf16.mxu0 %v2592_v51  ;;  %v2082_v35 = vcombine.low %v2971_v15, %v378_v28  ;;  %v2083_v36 = vcombine.low %v2976_v17, %v382_v33  ;;  %v379_v51 = vld [vmem:[%s2790_s10 + $0xd8] sm:$0x11]  ;;  %v2107_v19 = vcombine.low %v558_v61, %v565_v62  ;;  %v2617_v60 = vld [vmem:[%s3161_s2 + $0x10] sm:$0xff]  }
  0x36   : > { %2419 = vmatprep.subr.bf16.mxu1 %v2593_v57  ;;  %v2608_v57 = vld [vmem:[%s3160_s1 + $0x178] sm:$0xff]   ;;  %v578_v20 = vrot.slane %v576_v1, 1  ;;  %v2626_v61 = vld [vmem:[%s3161_s2 + $0x30] sm:$0xff]  }
  0x37   : > { %1321 = vmatmul.mubr.bf16.gmra.mrb[8].mxu0 %v2111_v45  ;;  %v477_v45 = vshrl.u32 %v2082_v35, 16  ;;  %v479_v46 = vshll.u32 %v2082_v35, 16  ;;  %v484_v49 = vshrl.u32 %v2083_v36, 16  ;;  %v486_v50 = vshll.u32 %v2083_v36, 16  ;;  %v2615_v35 = vld [vmem:[%s3161_s2 + $0x8] sm:$0xff]  }
  0x38   : > { %2380 = vmatpush3.bf16.msra.mxu0 %v2594_v58  ;;  %1386 = vmatmul.mubr.bf16.gmra.mrb[8].mxu1 %v2113_v16  ;;  %v2613_v16 = vld [vmem:[%s3161_s2] sm:$0xff]   ;;  %v579_v28 = vor.u32 %v578_v20, %v574_v10  ;;  %v3062_v36 = vcombine.high %v2851_v0, %v2859_v3 }
  0x39   : > { %2420 = vmatpush3.bf16.msra.mxu1 %v2595_v2  ;;  %2381 = vmatprep.subr.bf16.mxu0 %v2596_v5  ;;  %v481_v52 = vrot.slane %v479_v46, 1  ;;  %v488_v56 = vrot.slane %v486_v50, 1  ;;  %v567_v5 = vshrl.u32 %v2965_v13, 16  ;;  %v2091_v13 = vcombine.low %v2987_v24, %v383_v54 }
  0x3a   : > { %2421 = vmatprep.subr.bf16.mxu1 %v2597_v7  ;;  %1328 = vmatprep.mubr.bf16.mxu0 %v2121_v23  ;;  %v3029_v7 = vcombine.high %v2805_v37, %v2808_v38  ;;  %v2612_v37 = vld [vmem:[%s3160_s1 + $0x200] sm:$0xff]   ;;  %v571_v38 = vrot.slane %v569_v42, 1  ;;  %v2616_v23 = vld [vmem:[%s3160_s1 + $0x210] sm:$0xff]   ;;  %v2108_v46 = vcombine.low %v2848_v63, %v2904_v30  ;;  %v2115_v50 = vcombine.high %v2917_v40, %v2923_v44 }
  0x3b   : > { %1393 = vmatprep.mubr.bf16.mxu1 %v2123_v29  ;;  %v3016_v58 = vor.u32 %v481_v52, %v477_v45  ;;  %v3021_v2 = vor.u32 %v488_v56, %v484_v49  ;;  %v2109_v29 = vcombine.high %v2848_v63, %v2904_v30  ;;  %v2619_v49 = vld [vmem:[%s3161_s2 + $0x18] sm:$0xff]   ;;  %v2622_v30 = vld [vmem:[%s3160_s1 + $0x228] sm:$0xff]   ;;  %v384_v52 = vld [vmem:[%s2790_s10 + $0x100] sm:$0xff]  ;;  %v2117_v44 = vcombine.low %v2914_v39, %v2971_v15 }
  0x3c   : > { %2382 = vmatpush3.bf16.msra.mxu0 %v2598_v12  ;;  %v2090_v12 = vcombine.low %v2979_v18, %v379_v51  ;;  %v2621_v51 = vld [vmem:[%s3161_s2 + $0x20] sm:$0xff]   ;;  %v385_v40 = vld [vmem:[%s2790_s10 + $0x110] sm:$0x11]  ;;  %v2127_v54 = vcombine.high %v2976_v17, %v384_v52  ;;  %v2623_v56 = vld [vmem:[%s3161_s2 + $0x28] sm:$0xff]  }
  0x3d   : > { %2422 = vmatpush3.bf16.msra.mxu1 %v2599_v14  ;;  %2383 = vmatprep.subr.bf16.mxu0 %v2604_v41  ;;  %v2122_v14 = vcombine.low %v3016_v58, %v3021_v2  ;;  %v588_v41 = vshrl.u32 %v2091_v13, 16 }
  0x3e   : > { %2423 = vmatprep.subr.bf16.mxu1 %v2605_v47  ;;  %v583_v22 = vshll.u32 %v2090_v12, 16  ;;  %v581_v33 = vshrl.u32 %v2090_v12, 16  ;;  %v2620_v47 = vld [vmem:[%s3160_s1 + $0x220] sm:$0xff]  }
  0x3f   : > { %1329 = vmatmul.mubr.bf16.gmra.mrb[12].mxu0 %v2120_v26  ;;  %v572_v26 = vor.u32 %v571_v38, %v567_v5 }
  0x40   : > { %1434 = vmatprep.mubr.bf16.mxu0 %v2098_v31  ;;  %2384 = vmatpush3.bf16.msra.mxu0 %v2606_v48  ;;  %v590_v31 = vshll.u32 %v2091_v13, 16  ;;  %v585_v43 = vrot.slane %v583_v22, 1  ;;  %v2118_v48 = vcombine.high %v2914_v39, %v2971_v15  ;;  %v2101_v39 = vcombine.low %v2828_v55, %v2890_v25  ;;  %v2627_v15 = vld [vmem:[%s3160_s1 + $0x238] sm:$0xff]  }
  0x41   : > { %2424 = vmatpush3.bf16.msra.mxu1 %v2607_v53  ;;  %2385 = vmatprep.subr.bf16.mxu0 %v2608_v57  ;;  %v2116_v42 = vcombine.low %v572_v26, %v579_v28  ;;  %v2625_v53 = vld [vmem:[%s3160_s1 + $0x230] sm:$0xff]   ;;  %v2092_v57 = vcombine.low %v384_v52, %v385_v40  ;;  %v2110_v55 = vcombine.low %v2895_v27, %v2953_v6  ;;  %v2628_v25 = vld [vmem:[%s3161_s2 + $0x38] sm:$0xff]  }
  0x42   : > { %2425 = vmatprep.subr.bf16.mxu1 %v2609_v59  ;;  %1394 = vmatmul.mubr.bf16.gmra.mrb[12].mxu1 %v2122_v14  ;;  %v592_v45 = vrot.slane %v590_v31, 1  ;;  %v586_v0 = vor.u32 %v585_v43, %v581_v33  ;;  %v2124_v59 = vcombine.high %v2979_v18, %v2987_v24  ;;  %v2126_v18 = vcombine.low %v2976_v17, %v384_v52 }
  0x43   : > { %1499 = vmatprep.mubr.bf16.mxu1 %v2100_v9  ;;  %v603_v62 = vshll.u32 %v2092_v57, 16  ;;  %v601_v24 = vshrl.u32 %v2092_v57, 16 }
  0x44   : > { %2386 = vmatpush3.bf16.msra.mxu0 %v2610_v4  ;;  %v593_v3 = vor.u32 %v592_v45, %v588_v41  ;;  %v2119_v4 = vcombine.low %v2959_v11, %v3016_v58 }
  0x45   : > { %2426 = vmatpush3.bf16.msra.mxu1 %v2611_v8  ;;  %2475 = vmatprep.subr.bf16.mxu0 %v2612_v37  ;;  %v605_v1 = vrot.slane %v603_v62, 1 }
  0x46   : > { %2499 = vmatprep.subr.bf16.mxu1 %v2613_v16  ;;  %v2125_v63 = vcombine.low %v586_v0, %v593_v3 }
  0x47   : > { %1435 = vmatmul.mubr.bf16.vlgmr.msra.gmra.mrb[16].mxu0 %v3029_v7  ;;  %v606_v17 = vor.u32 %v605_v1, %v601_v24 }
  0x48   : > { %2476 = vmatpush3.bf16.msra.mxu0 %v2612_v37  ;;  %1442 = vmatprep.mubr.bf16.mxu0 %v2107_v19 }
  0x49   : > { %2477 = vmatprep.subr.bf16.mxu0 %v2614_v21  ;;  %v2128_v27 = vcombine.low %v3021_v2, %v606_v17 }
  0x4a   : > { %1500 = vmatmul.mubr.bf16.vlgmr.msra.gmra.mrb[16].mxu1 %v2099_v32 }
  0x4b   : > { %2500 = vmatpush3.bf16.msra.mxu1 %v2613_v16  ;;  %1507 = vmatprep.mubr.bf16.mxu1 %v2109_v29 }
  0x4c   : > { %2478 = vmatpush3.bf16.msra.mxu0 %v2614_v21  ;;  %2501 = vmatprep.subr.bf16.mxu1 %v2615_v35 }
  0x4d   : > { %2479 = vmatprep.subr.bf16.mxu0 %v2616_v23 }
  0x4f   : > { %1443 = vmatmul.mubr.bf16.gmra.mrb[20].mxu0 %v3062_v36  ;;  %2502 = vmatpush3.bf16.msra.mxu1 %v2615_v35 }
  0x50   : > { %2480 = vmatpush3.bf16.msra.mxu0 %v2616_v23  ;;  %1450 = vmatprep.mubr.bf16.mxu0 %v2116_v42 }
  0x51   : > { %2481 = vmatprep.subr.bf16.mxu0 %v2618_v34  ;;  %2503 = vmatprep.subr.bf16.mxu1 %v2617_v60 }
  0x52   : > { %1508 = vmatmul.mubr.bf16.gmra.mrb[20].mxu1 %v2108_v46 }
  0x53   : > { %2504 = vmatpush3.bf16.msra.mxu1 %v2617_v60  ;;  %1515 = vmatprep.mubr.bf16.mxu1 %v2118_v48 }
  0x54   : > { %2482 = vmatpush3.bf16.msra.mxu0 %v2618_v34  ;;  %2505 = vmatprep.subr.bf16.mxu1 %v2619_v49 }
  0x55   : > { %2483 = vmatprep.subr.bf16.mxu0 %v2620_v47 }
  0x57   : > { %1451 = vmatmul.mubr.bf16.gmra.mrb[24].mxu0 %v2115_v50  ;;  %2506 = vmatpush3.bf16.msra.mxu1 %v2619_v49 }
  0x58   : > { %2484 = vmatpush3.bf16.msra.mxu0 %v2620_v47  ;;  %1458 = vmatprep.mubr.bf16.mxu0 %v2125_v63 }
  0x59   : > { %2485 = vmatprep.subr.bf16.mxu0 %v2622_v30  ;;  %2507 = vmatprep.subr.bf16.mxu1 %v2621_v51 }
  0x5a   : > { %1516 = vmatmul.mubr.bf16.gmra.mrb[24].mxu1 %v2117_v44 }
  0x5b   : > { %2508 = vmatpush3.bf16.msra.mxu1 %v2621_v51  ;;  %1523 = vmatprep.mubr.bf16.mxu1 %v2127_v54 }
  0x5c   : > { %2486 = vmatpush3.bf16.msra.mxu0 %v2622_v30  ;;  %2509 = vmatprep.subr.bf16.mxu1 %v2623_v56 }
  0x5d   : > { %2487 = vmatprep.subr.bf16.mxu0 %v2625_v53 }
  0x5f   : > { %1459 = vmatmul.mubr.bf16.gmra.mrb[28].mxu0 %v2124_v59  ;;  %2510 = vmatpush3.bf16.msra.mxu1 %v2623_v56 }
  0x60   : > { %2488 = vmatpush3.bf16.msra.mxu0 %v2625_v53  ;;  %2491 = vmatprep.mubr.bf16.mxu0 %v2101_v39 }
  0x61   : > { %2489 = vmatprep.subr.bf16.mxu0 %v2627_v15  ;;  %2511 = vmatprep.subr.bf16.mxu1 %v2626_v61 }
  0x62   : > { %1524 = vmatmul.mubr.bf16.gmra.mrb[28].mxu1 %v2126_v18 }
  0x63   : > { %2512 = vmatpush3.bf16.msra.mxu1 %v2626_v61  ;;  %2515 = vmatprep.mubr.bf16.mxu1 %v3029_v7 }
  0x64   : > { %2490 = vmatpush3.bf16.msra.mxu0 %v2627_v15  ;;  %2513 = vmatprep.subr.bf16.mxu1 %v2628_v25 }
  0x67   : > { %2492 = vmatmul.mubr.bf16.vlgmr.msra.gmra.mrb[32].mxu0 %v2110_v55  ;;  %2514 = vmatpush3.bf16.msra.mxu1 %v2628_v25 }
  0x68   : > { %2495 = vmatprep.mubr.bf16.mxu0 %v2119_v4 }
  0x6a   : > { %2516 = vmatmul.mubr.bf16.vlgmr.msra.gmra.mrb[32].mxu1 %v3062_v36 }
  0x6b   : > { %2519 = vmatprep.mubr.bf16.mxu1 %v2115_v50 }
  0x6f   : > { %2496 = vmatmul.mubr.bf16.gmra.mrb[36].mxu0 %v2128_v27 }
  0x72   : > { %2520 = vmatmul.mubr.bf16.gmra.mrb[36].mxu1 %v2124_v59 }
  0xfa   : > { %v2307_v6 = vpop.f32.mrb[0].mxu0 }
  0xfb   : > { %v2308_v5 = vpop.f32.mrb[1].mxu0  ;;  %v2347_v10 = vpop.f32.mrb[0].mxu1 }
  0xfc   : > { %v2309_v8 = vadd.f32 %v2308_v5, %v2307_v6  ;;  %v2310_v11 = vpop.f32.mrb[2].mxu0  ;;  %v2348_v7 = vpop.f32.mrb[1].mxu1 }
  0xfd   : > { %v2311_v58 = vpop.f32.mrb[3].mxu0  ;;  %v2349_v12 = vadd.f32 %v2348_v7, %v2347_v10  ;;  %v2350_v14 = vpop.f32.mrb[2].mxu1 }
  0xfe   : > { %v2312_v9 = vadd.f32 %v2311_v58, %v2310_v11  ;;  %v2351_v37 = vpop.f32.mrb[3].mxu1 }
  0xff   : > { %v1372_v13 = vadd.f32 %v2349_v12, %v2309_v8  ;;  %v2352_v16 = vadd.f32 %v2351_v37, %v2350_v14 }
 0x101   : > { %v1375_v21 = vadd.f32 %v2352_v16, %v2312_v9 }
 0x102   : > { %v2313_v38 = vpop.f32.mrb[4].mxu0 }
 0x103   : > { %v2314_v2 = vpop.f32.mrb[5].mxu0  ;;  %v2353_v26 = vpop.f32.mrb[4].mxu1 }
 0x104   : > { %v2315_v19 = vadd.f32 %v2314_v2, %v2313_v38  ;;  %v2316_v20 = vpop.f32.mrb[6].mxu0  ;;  %v2354_v28 = vpop.f32.mrb[5].mxu1 }
 0x105   : > { %v2317_v22 = vpop.f32.mrb[7].mxu0  ;;  %v2355_v31 = vadd.f32 %v2354_v28, %v2353_v26  ;;  %v2356_v32 = vpop.f32.mrb[6].mxu1 }
 0x106   : > { %v2318_v23 = vadd.f32 %v2317_v22, %v2316_v20  ;;  %v2357_v29 = vpop.f32.mrb[7].mxu1 }
 0x107   : > { %v1380_v35 = vadd.f32 %v2355_v31, %v2315_v19  ;;  %v2358_v36 = vadd.f32 %v2357_v29, %v2356_v32 }
 0x109   : > { %v1383_v45 = vadd.f32 %v2358_v36, %v2318_v23 }
 0x10a   : > { %v2319_v33 = vpop.f32.mrb[8].mxu0 }
 0x10b   : > { %v2320_v41 = vpop.f32.mrb[9].mxu0  ;;  %v2359_v0 = vpop.f32.mrb[8].mxu1 }
 0x10c   : > { %v2321_v42 = vadd.f32 %v2320_v41, %v2319_v33  ;;  %v2322_v43 = vpop.f32.mrb[10].mxu0  ;;  %v2360_v3 = vpop.f32.mrb[9].mxu1 }
 0x10d   : > { %v2323_v34 = vpop.f32.mrb[11].mxu0  ;;  %v2361_v46 = vadd.f32 %v2360_v3, %v2359_v0  ;;  %v2362_v47 = vpop.f32.mrb[10].mxu1 }
 0x10e   : > { %v2324_v60 = vadd.f32 %v2323_v34, %v2322_v43  ;;  %v2363_v49 = vpop.f32.mrb[11].mxu1 }
 0x10f   : > { %v1388_v63 = vadd.f32 %v2361_v46, %v2321_v42  ;;  %v2364_v30 = vadd.f32 %v2363_v49, %v2362_v47 }
 0x111   : > { %v1391_v44 = vadd.f32 %v2364_v30, %v2324_v60 }
 0x112   : > { %v2325_v48 = vpop.f32.mrb[12].mxu0 }
 0x113   : > { %v2326_v50 = vpop.f32.mrb[13].mxu0 }
 0x114   : > { %v2327_v51 = vadd.f32 %v2326_v50, %v2325_v48  ;;  %v2328_v52 = vpop.f32.mrb[14].mxu0 }
 0x115   : > { %v2329_v40 = vpop.f32.mrb[15].mxu0  ;;  %v2365_v54 = vpop.f32.mrb[12].mxu1 }
 0x116   : > { %v2330_v53 = vadd.f32 %v2329_v40, %v2328_v52  ;;  %v2366_v56 = vpop.f32.mrb[13].mxu1 }
 0x117   : > { %v2367_v59 = vadd.f32 %v2366_v56, %v2365_v54  ;;  %v2368_v39 = vpop.f32.mrb[14].mxu1 }
 0x118   : > { %v2369_v61 = vpop.f32.mrb[15].mxu1 }
 0x119   : > { %v1396_v55 = vadd.f32 %v2367_v59, %v2327_v51  ;;  %v2370_v25 = vadd.f32 %v2369_v61, %v2368_v39 }
 0x11a   : > { %v2387_v57 = vpop.f32.mrb[16].mxu0 }
 0x11b   : > { %v2388_v15 = vpop.f32.mrb[17].mxu0  ;;  %v1399_v17 = vadd.f32 %v2370_v25, %v2330_v53 }
 0x11c   : > { %v2389_v62 = vadd.f32 %v2388_v15, %v2387_v57  ;;  %v2390_v18 = vpop.f32.mrb[18].mxu0 }
 0x11d   : > { %v2391_v24 = vpop.f32.mrb[19].mxu0  ;;  %v2427_v6 = vpop.f32.mrb[16].mxu1 }
 0x11e   : > { %v1437_v1 = vadd.f32 %v2389_v62, %v1372_v13  ;;  %v2392_v4 = vadd.f32 %v2391_v24, %v2390_v18  ;;  %v2428_v5 = vpop.f32.mrb[17].mxu1 }
 0x11f   : > { %v2429_v8 = vadd.f32 %v2428_v5, %v2427_v6  ;;  %v2430_v11 = vpop.f32.mrb[18].mxu1 }
 0x120   : > { %v1440_v27 = vadd.f32 %v2392_v4, %v1375_v21  ;;  %v2431_v9 = vpop.f32.mrb[19].mxu1 }
 0x121   : > { %v2432_v7 = vadd.f32 %v2431_v9, %v2430_v11  ;;  %v1502_v37 = vadd.f32 %v2429_v8, %v1437_v1 }
 0x122   : > { %v2393_v58 = vpop.f32.mrb[20].mxu0 }
 0x123   : > { %v2394_v10 = vpop.f32.mrb[21].mxu0  ;;  %v1505_v19 = vadd.f32 %v2432_v7, %v1440_v27 }
 0x124   : > { %v2395_v12 = vadd.f32 %v2394_v10, %v2393_v58  ;;  %v2396_v14 = vpop.f32.mrb[22].mxu0 }
 0x125   : > { %v2397_v38 = vpop.f32.mrb[23].mxu0  ;;  %v2433_v20 = vpop.f32.mrb[20].mxu1 }
 0x126   : > { %v1445_v16 = vadd.f32 %v2395_v12, %v1380_v35  ;;  %v2398_v2 = vadd.f32 %v2397_v38, %v2396_v14  ;;  %v2434_v22 = vpop.f32.mrb[21].mxu1 }
 0x127   : > { %v2435_v23 = vadd.f32 %v2434_v22, %v2433_v20  ;;  %v2436_v21 = vpop.f32.mrb[22].mxu1 }
 0x128   : > { %v1448_v13 = vadd.f32 %v2398_v2, %v1383_v45  ;;  %v2437_v28 = vpop.f32.mrb[23].mxu1 }
 0x129   : > { %v2438_v32 = vadd.f32 %v2437_v28, %v2436_v21  ;;  %v1510_v36 = vadd.f32 %v2435_v23, %v1445_v16 }
 0x12a   : > { %v2399_v26 = vpop.f32.mrb[24].mxu0 }
 0x12b   : > { %v2400_v31 = vpop.f32.mrb[25].mxu0  ;;  %v1513_v34 = vadd.f32 %v2438_v32, %v1448_v13 }
 0x12c   : > { %v2401_v29 = vadd.f32 %v2400_v31, %v2399_v26  ;;  %v2402_v33 = vpop.f32.mrb[26].mxu0 }
 0x12d   : > { %v2403_v41 = vpop.f32.mrb[27].mxu0  ;;  %v2439_v60 = vpop.f32.mrb[24].mxu1 }
 0x12e   : > { %v1453_v42 = vadd.f32 %v2401_v29, %v1388_v63  ;;  %v2404_v43 = vadd.f32 %v2403_v41, %v2402_v33  ;;  %v2440_v0 = vpop.f32.mrb[25].mxu1 }
 0x12f   : > { %v2441_v3 = vadd.f32 %v2440_v0, %v2439_v60  ;;  %v2442_v46 = vpop.f32.mrb[26].mxu1 }
 0x130   : > { %v1456_v35 = vadd.f32 %v2404_v43, %v1391_v44  ;;  %v2443_v47 = vpop.f32.mrb[27].mxu1 }
 0x131   : > { %v2444_v49 = vadd.f32 %v2443_v47, %v2442_v46  ;;  %v1518_v51 = vadd.f32 %v2441_v3, %v1453_v42 }
 0x132   : > { %v2405_v45 = vpop.f32.mrb[28].mxu0 }
 0x133   : > { %v2406_v48 = vpop.f32.mrb[29].mxu0  ;;  %v1521_v54 = vadd.f32 %v2444_v49, %v1456_v35 }
 0x134   : > { %v2407_v50 = vadd.f32 %v2406_v48, %v2405_v45  ;;  %v2408_v30 = vpop.f32.mrb[30].mxu0 }
 0x135   : > { %v2409_v52 = vpop.f32.mrb[31].mxu0  ;;  %v2445_v63 = vpop.f32.mrb[28].mxu1 }
 0x136   : > { %v1461_v40 = vadd.f32 %v2407_v50, %v1396_v55  ;;  %v2410_v53 = vadd.f32 %v2409_v52, %v2408_v30  ;;  %v2446_v57 = vpop.f32.mrb[29].mxu1 }
 0x137   : > { %v2447_v59 = vadd.f32 %v2446_v57, %v2445_v63  ;;  %v2448_v44 = vpop.f32.mrb[30].mxu1 }
 0x138   : > { %v1464_v56 = vadd.f32 %v2410_v53, %v1399_v17  ;;  %v2449_v15 = vpop.f32.mrb[31].mxu1 }
 0x139   : > { %v2450_v18 = vadd.f32 %v2449_v15, %v2448_v44  ;;  %v1526_v1 = vadd.f32 %v2447_v59, %v1461_v40 }
 0x13a   : > { %v2493_v39 = vpop.f32.mrb[32].mxu0 }
 0x13b   : > { %v1575_v61 = vadd.f32 %v2493_v39, %v1510_v36  ;;  %v1566_v62 = vpop.f32.mrb[33].mxu0  ;;  %v1529_v17 = vadd.f32 %v2450_v18, %v1464_v56 }
 0x13c   : > { %v1567_v25 = vadd.f32 %v1566_v62, %v1502_v37  ;;  %v2494_v24 = vpop.f32.mrb[34].mxu0 }
 0x13d   : > { %v1578_v4 = vadd.f32 %v2494_v24, %v1513_v34  ;;  %v1569_v27 = vpop.f32.mrb[35].mxu0  ;;  %v2517_v5 = vpop.f32.mrb[32].mxu1  ;;  %v1653_v7 = vmul.f32 %v1575_v61, %v1575_v61 }
 0x13e   : > { %v1570_v55 = vadd.f32 %v1569_v27, %v1505_v19  ;;  %v1651_v8 = vmul.f32 %v1567_v25, %v1567_v25  ;;  %v1771_v10 = vpop.f32.mrb[33].mxu1  ;;  %v1858_v32 = vmul.f32 %v2517_v5, %v2517_v5 }
 0x13f   : > { %v2253_v6 = vpack.c.bf16 %v1578_v4, %v1575_v61  ;;  %v1856_v12 = vmul.f32 %v1771_v10, %v1771_v10  ;;  %v2518_v14 = vpop.f32.mrb[34].mxu1  ;;  %v1654_v2 = vmul.f32 %v1578_v4, %v1578_v4 }
 0x140   : > { %v2248_v11 = vpack.c.bf16 %v1570_v55, %v1567_v25  ;;  %v1637_v58 = vadd.f32 %v1570_v55, %v1567_v25  ;;  %v1652_v9 = vmul.f32 %v1570_v55, %v1570_v55  ;;  %v2273_v19 = vpack.c.bf16 %v2518_v14, %v2517_v5  ;;  %v1774_v20 = vpop.f32.mrb[35].mxu1 }
 0x141   : > { %2285 = vst [vmem:[%s3125_s18 + $0x8] sm:$0xff] %v2253_v6   ;;  %v2268_v21 = vpack.c.bf16 %v1774_v20, %v1771_v10  ;;  %v1842_v26 = vadd.f32 %v1774_v20, %v1771_v10  ;;  %v1857_v28 = vmul.f32 %v1774_v20, %v1774_v20  ;;  %v1859_v35 = vmul.f32 %v2518_v14, %v2518_v14 }
 0x142   : > { %2249 = vst [vmem:[%s3125_s18] sm:$0xff] %v2248_v11   ;;  %v1638_v37 = vadd.f32 %v1637_v58, %v1575_v61  ;;  %v1659_v38 = vadd.f32 %v1652_v9, %v1651_v8  ;;  %v2497_v16 = vpop.f32.mrb[36].mxu0  ;;  %2288 = vst [vmem:[%s3131_s21 + $0x8] sm:$0xff] %v2273_v19  }
 0x143   : > { %v1591_v13 = vadd.f32 %v2497_v16, %v1526_v1  ;;  %v1582_v22 = vpop.f32.mrb[37].mxu0  ;;  %2269 = vst [vmem:[%s3131_s21] sm:$0xff] %v2268_v21   ;;  %v1843_v42 = vadd.f32 %v2517_v5, %v1842_v26  ;;  %v1864_v43 = vadd.f32 %v1857_v28, %v1856_v12 }
 0x144   : > { %v1660_v23 = vadd.f32 %v1659_v38, %v1653_v7  ;;  %v2498_v31 = vpop.f32.mrb[38].mxu0  ;;  %v1583_v29 = vadd.f32 %v1582_v22, %v1518_v51  ;;  %v1639_v33 = vadd.f32 %v1638_v37, %v1578_v4 }
 0x145   : > { %v1594_v36 = vadd.f32 %v2498_v31, %v1529_v17  ;;  %v1585_v41 = vpop.f32.mrb[39].mxu0  ;;  %v1865_v45 = vadd.f32 %v1864_v43, %v1858_v32  ;;  %v2521_v47 = vpop.f32.mrb[36].mxu1  ;;  %v1844_v48 = vadd.f32 %v2518_v14, %v1843_v42 }
 0x146   : > { %v1661_v34 = vadd.f32 %v1660_v23, %v1654_v2  ;;  %v1586_v60 = vadd.f32 %v1585_v41, %v1521_v54  ;;  %v1640_v0 = vadd.f32 %v1639_v33, %v1583_v29  ;;  %v1655_v3 = vmul.f32 %v1583_v29, %v1583_v29  ;;  %v1787_v51 = vpop.f32.mrb[37].mxu1 }
 0x147   : > { %v2263_v46 = vpack.c.bf16 %v1594_v36, %v1591_v13  ;;  %v1845_v40 = vadd.f32 %v1844_v48, %v1787_v51  ;;  %v1860_v53 = vmul.f32 %v1787_v51, %v1787_v51  ;;  %v1866_v63 = vadd.f32 %v1865_v45, %v1859_v35  ;;  %v2522_v56 = vpop.f32.mrb[38].mxu1 }
 0x148   : > { %v2258_v49 = vpack.c.bf16 %v1586_v60, %v1583_v29  ;;  %v1656_v50 = vmul.f32 %v1586_v60, %v1586_v60  ;;  %v1662_v30 = vadd.f32 %v1661_v34, %v1655_v3  ;;  %v1641_v52 = vadd.f32 %v1640_v0, %v1586_v60  ;;  %v1790_v39 = vpop.f32.mrb[39].mxu1 }
 0x149   : > { %2287 = vst [vmem:[%s3125_s18 + $0x18] sm:$0xff] %v2263_v46   ;;  %v1657_v54 = vmul.f32 %v1591_v13, %v1591_v13  ;;  %v2283_v57 = vpack.c.bf16 %v2522_v56, %v2521_v47  ;;  %v1867_v15 = vadd.f32 %v1866_v63, %v1860_v53  ;;  %v2278_v61 = vpack.c.bf16 %v1790_v39, %v1787_v51 }
 0x14a   : > { %2286 = vst [vmem:[%s3125_s18 + $0x10] sm:$0xff] %v2258_v49   ;;  %v1642_v59 = vadd.f32 %v1641_v52, %v1591_v13  ;;  %v1663_v44 = vadd.f32 %v1662_v30, %v1656_v50  ;;  %v1846_v62 = vadd.f32 %v1845_v40, %v1790_v39  ;;  %v1861_v18 = vmul.f32 %v1790_v39, %v1790_v39 }
 0x14b   : > { %v1658_v25 = vmul.f32 %v1594_v36, %v1594_v36  ;;  %2290 = vst [vmem:[%s3131_s21 + $0x18] sm:$0xff] %v2283_v57   ;;  %v1862_v4 = vmul.f32 %v2521_v47, %v2521_v47  ;;  %2289 = vst [vmem:[%s3131_s21 + $0x10] sm:$0xff] %v2278_v61   ;;  %v1863_v5 = vmul.f32 %v2522_v56, %v2522_v56 }
 0x14c   : > { %v1643_v24 = vadd.f32 %v1642_v59, %v1594_v36  ;;  %v1664_v1 = vadd.f32 %v1663_v44, %v1657_v54  ;;  %v1847_v27 = vadd.f32 %v2521_v47, %v1846_v62  ;;  %v1868_v55 = vadd.f32 %v1867_v15, %v1861_v18 }
 0x14e   : > { %v1644_v17 = vrot.slane %v1643_v24, 4  ;;  %v1665_v6 = vadd.f32 %v1664_v1, %v1658_v25  ;;  %v1848_v8 = vadd.f32 %v2522_v56, %v1847_v27  ;;  %v1869_v11 = vadd.f32 %v1868_v55, %v1862_v4 }
 0x150   : > { %v1645_v58 = vadd.f32 %v1644_v17, %v1643_v24  ;;  %v1666_v9 = vrot.slane %v1665_v6, 4  ;;  %v1849_v10 = vrot.slane %v1848_v8, 4  ;;  %v1870_v7 = vadd.f32 %v1869_v11, %v1863_v5 }
 0x152   : > { %v1646_v12 = vrot.slane %v1645_v58, 2  ;;  %v1667_v14 = vadd.f32 %v1666_v9, %v1665_v6  ;;  %v1850_v37 = vadd.f32 %v1849_v10, %v1848_v8  ;;  %v1871_v38 = vrot.slane %v1870_v7, 4 }
 0x154   : > { %v1647_v16 = vadd.f32 %v1646_v12, %v1645_v58  ;;  %v1668_v2 = vrot.slane %v1667_v14, 2  ;;  %v1851_v19 = vrot.slane %v1850_v37, 2  ;;  %v1872_v20 = vadd.f32 %v1871_v38, %v1870_v7 }
 0x156   : > { %v1648_v13 = vrot.slane %v1647_v16, 1  ;;  %v1669_v22 = vadd.f32 %v1668_v2, %v1667_v14  ;;  %v1852_v23 = vadd.f32 %v1851_v19, %v1850_v37  ;;  %v1873_v21 = vrot.slane %v1872_v20, 2 }
 0x158   : > { %v1649_v26 = vadd.f32 %v1648_v13, %v1647_v16  ;;  %v1670_v28 = vrot.slane %v1669_v22, 1  ;;  %v1853_v31 = vrot.slane %v1852_v23, 1  ;;  %v1874_v32 = vadd.f32 %v1873_v21, %v1872_v20 }
 0x15a   : > { %1650 = vst [vmem:[%s336_s24] sm:$0x1] %v1649_v26  ;;  %v1671_v29 = vadd.f32 %v1670_v28, %v1669_v22  ;;  %v1854_v33 = vadd.f32 %v1853_v31, %v1852_v23  ;;  %v1875_v36 = vrot.slane %v1874_v32, 1 }
 0x15c   : > { %1672 = vst [vmem:[%s339_s29] sm:$0x1] %v1671_v29  ;;  %1855 = vst [vmem:[%s347_s9] sm:$0x1] %v1854_v33  ;;  %v1876_v41 = vadd.f32 %v1875_v36, %v1874_v32 }
 0x15e   : > { %1877 = vst [vmem:[%s350_s13] sm:$0x1] %v1876_v41 }
 0x15f PF: > { %s19_s27 = sadd.s32 1, %s2635_s27  }
 0x160   : > { %p16_p4 = scmp.ge.s32.totalorder %s19_s27, 4  }
 0x162   :  { %18 = sbr.rel (!%p16_p4) target bundleno = 1 (0x1), region = 122 }

// kernel: resnet_enc_small_block.4
= control target key start
LH: loop header
LB: loop body
LE: loop exit
PB: predicated region body
PF: predicated region fallthrough
CT: control target
= control target key end

     0   :  { %s2171_s21 = smov 0   ;;  %s2637_s0 = inlined_call_operand.vmem [shape: bf16[2,8,8,128], index: 0, kind: input, shape index: {}]   ;;  %s2638_s1 = inlined_call_operand.vmem [shape: f32[1,128], index: 1, kind: input, shape index: {}]   ;;  %s2639_s2 = inlined_call_operand.vmem [shape: f32[1,128], index: 2, kind: input, shape index: {}]   ;;  %s2640_s3 = inlined_call_operand.vmem [shape: bf16[1152,128], index: 3, kind: input, shape index: {}]   ;;  %s2641_s4 = inlined_call_operand.vmem [shape: bf16[2,8,8,128], index: 4, kind: output, shape index: {0}]   ;;  %s2642_s5 = inlined_call_operand.vmem [shape: f32[2,1,128], index: 5, kind: output, shape index: {1}]   ;;  %s2643_s6 = inlined_call_operand.vmem [shape: f32[2,1,128], index: 6, kind: output, shape index: {2}]  }
   0x1 LB: > { %s1662_s22 = sadd.s32 4294967295, %s2133_s21   ;;  %p1666_p0 = scmp.ge.s32.totalorder %s2133_s21, 1  ;;  %s2133_s21 = sphi %s2171_s21, %s17_s21  }
   0x2   : > { %p217_p1 = scmp.lt.s32.totalorder %s2133_s21, 3 }
   0x4   : > { %p218_p2 = pnand %p1666_p0, %p217_p1 }
   0x5   : > { %v2055_v0 = vld [vmem:[%s2640_s3 + $0x40] sm:$0xff] (!%p218_p2)   ;;  %v2059_v4 = vld [vmem:[%s2640_s3 + $0x48] sm:$0xff] (!%p218_p2)   ;;  %v2063_v8 = vld [vmem:[%s2640_s3 + $0x50] sm:$0xff] (!%p218_p2)   ;;  %p253_p3 = scmp.lt.s32.totalorder (!%p218_p2), %s1662_s22, 1  ;;  %vm396_vm0 = vcmask (!%p218_p2), 1040384   ;;  %vm407_vm2 = vcmask (!%p218_p2), 1044480  }
   0x6   : > { %221 = sbr.rel (%p218_p2) target bundleno = 358 (0x166), region = 36  ;;  %v2056_v1 = vld [vmem:[%s2640_s3 + $0xc0] sm:$0xff] (!%p218_p2)   ;;  %1834 = vmatprep.subr.bf16.mxu0 (!%p218_p2), %v2055_v0  ;;  %v2060_v5 = vld [vmem:[%s2640_s3 + $0xc8] sm:$0xff] (!%p218_p2)   ;;  %v2064_v9 = vld [vmem:[%s2640_s3 + $0xd0] sm:$0xff] (!%p218_p2)   ;;  %vm397_vm1 = vsmask.f32 (!%p218_p2), 256 }
   0x7   : > { %v2057_v2 = vld [vmem:[%s2640_s3] sm:$0xff] (!%p218_p2)   ;;  %1874 = vmatprep.subr.bf16.mxu1 (!%p218_p2), %v2056_v1  ;;  %v2061_v6 = vld [vmem:[%s2640_s3 + $0x8] sm:$0xff] (!%p218_p2)   ;;  %v2065_v10 = vld [vmem:[%s2640_s3 + $0x10] sm:$0xff] (!%p218_p2)   ;;  %vm408_vm3 = vsmask.f32 (!%p218_p2), 4352 }
   0x8   : > { %v2058_v3 = vld [vmem:[%s2640_s3 + $0x80] sm:$0xff] (!%p218_p2)   ;;  %1835 = vmatpush3.bf16.msra.mxu0 (!%p218_p2), %v2057_v2  ;;  %v2062_v7 = vld [vmem:[%s2640_s3 + $0x88] sm:$0xff] (!%p218_p2)   ;;  %v2066_v11 = vld [vmem:[%s2640_s3 + $0x90] sm:$0xff] (!%p218_p2)   ;;  %v2135_v2 = vmov (!%p218_p2), 0  }
   0x9   : > { %1875 = vmatpush3.bf16.msra.mxu1 (!%p218_p2), %v2058_v3  ;;  %1836 = vmatprep.subr.bf16.mxu0 (!%p218_p2), %v2059_v4  ;;  %v2067_v12 = vld [vmem:[%s2640_s3 + $0x58] sm:$0xff] (!%p218_p2)   ;;  %v2071_v16 = vld [vmem:[%s2640_s3 + $0x60] sm:$0xff] (!%p218_p2)   ;;  %v2075_v20 = vld [vmem:[%s2640_s3 + $0x68] sm:$0xff] (!%p218_p2)   ;;  %v2329_v3 = vrot.slane (!%p218_p2), %v2135_v2, 1 }
   0xa   : > { %1876 = vmatprep.subr.bf16.mxu1 (!%p218_p2), %v2060_v5  ;;  %v2068_v13 = vld [vmem:[%s2640_s3 + $0xd8] sm:$0xff] (!%p218_p2)   ;;  %v2072_v17 = vld [vmem:[%s2640_s3 + $0xe0] sm:$0xff] (!%p218_p2)   ;;  %v2076_v21 = vld [vmem:[%s2640_s3 + $0xe8] sm:$0xff] (!%p218_p2)  }
   0xb   : > { %v2069_v14 = vld [vmem:[%s2640_s3 + $0x18] sm:$0xff] (!%p218_p2)   ;;  %v2073_v18 = vld [vmem:[%s2640_s3 + $0x20] sm:$0xff] (!%p218_p2)   ;;  %v2077_v22 = vld [vmem:[%s2640_s3 + $0x28] sm:$0xff] (!%p218_p2)  }
   0xc   : > { %1837 = vmatpush3.bf16.msra.mxu0 (!%p218_p2), %v2061_v6  ;;  %v2070_v15 = vld [vmem:[%s2640_s3 + $0x98] sm:$0xff] (!%p218_p2)   ;;  %v2074_v19 = vld [vmem:[%s2640_s3 + $0xa0] sm:$0xff] (!%p218_p2)   ;;  %v2078_v23 = vld [vmem:[%s2640_s3 + $0xa8] sm:$0xff] (!%p218_p2)  }
   0xd   : > { %1877 = vmatpush3.bf16.msra.mxu1 %v2062_v7  ;;  %1838 = vmatprep.subr.bf16.mxu0 %v2063_v8  ;;  %s2649_s22 = smov (!%p253_p3, %s1662_s22), 1  ;;  %v2079_v24 = vld [vmem:[%s2640_s3 + $0x70] sm:$0xff]   ;;  %v2083_v28 = vld [vmem:[%s2640_s3 + $0x78] sm:$0xff]   ;;  %v2292_v32 = vld [vmem:[%s2638_s1] ss:$0 sm:$0xff] }
   0xe   : > { %1878 = vmatprep.subr.bf16.mxu1 %v2064_v9  ;;  %v2080_v25 = vld [vmem:[%s2640_s3 + $0xf0] sm:$0xff]   ;;  %s1782_s9 = sshll.u32 %s2649_s22, 5  ;;  %v2084_v29 = vld [vmem:[%s2640_s3 + $0xf8] sm:$0xff]   ;;  %v2298_v36 = vld [vmem:[%s2639_s2] ss:$0 sm:$0xff]  ;;  %s265_s30 = scalar_lea.vmem %s2642_s5, %s2649_s22 }
   0xf   : > { %v2081_v26 = vld [vmem:[%s2640_s3 + $0x30] sm:$0xff]   ;;  %s2281_s18 = scalar_lea.vmem %s2637_s0, %s1782_s9  ;;  %v2085_v30 = vld [vmem:[%s2640_s3 + $0x38] sm:$0xff]   ;;  %v2087_v37 = vld [vmem:[%s2640_s3 + $0x140] sm:$0xff]   ;;  %s262_s28 = scalar_lea.vmem %s2641_s4, %s1782_s9 }
  0x10   : > { %1839 = vmatpush3.bf16.msra.mxu0 %v2065_v10  ;;  %v2082_v27 = vld [vmem:[%s2640_s3 + $0xb0] sm:$0xff]   ;;  %v2086_v31 = vld [vmem:[%s2640_s3 + $0xb8] sm:$0xff]   ;;  %v1793_v33 = vld [vmem:[%s2281_s18] sm:$0xff]   ;;  %s268_s10 = scalar_lea.vmem %s2643_s6, %s2649_s22 }
  0x11   : > { %1879 = vmatpush3.bf16.msra.mxu1 %v2066_v11  ;;  %1840 = vmatprep.subr.bf16.mxu0 %v2067_v12  ;;  %v1794_v34 = vunpack.c.l.bf16 %v1793_v33  ;;  %v1795_v35 = vunpack.c.h.bf16 %v1793_v33  ;;  %v2088_v40 = vld [vmem:[%s2640_s3 + $0x1c0] sm:$0xff]   ;;  %v1828_v47 = vld [vmem:[%s2281_s18 + $0x8] sm:$0xff]   ;;  %vm2311_vm4 = vmand %vm396_vm0, %vm397_vm1 }
  0x12   : > { %1880 = vmatprep.subr.bf16.mxu1 %v2068_v13  ;;  %v1798_v52 = vunpack.c.l.bf16 %v1828_v47  ;;  %v1799_v53 = vunpack.c.h.bf16 %v1828_v47  ;;  %vm2318_vm5 = vmand %vm407_vm2, %vm408_vm3  ;;  %v1829_v13 = vld [vmem:[%s2281_s18 + $0x10] sm:$0xff]   ;;  %v2119_v56 = vld [vmem:[%s2640_s3 + $0x200] sm:$0xff]  }
  0x13   : > { %v294_v38 = vmul.f32 %v1794_v34, %v2292_v32  ;;  %v295_v39 = vmul.f32 %v1795_v35, %v2292_v32  ;;  %v1803_v33 = vunpack.c.h.bf16 %v1829_v13  ;;  %v2095_v47 = vld [vmem:[%s2640_s3 + $0x150] sm:$0xff]  }
  0x14   : > { %1841 = vmatpush3.bf16.msra.mxu0 %v2069_v14  ;;  %v296_v57 = vmul.f32 %v1798_v52, %v2292_v32  ;;  %v297_v58 = vmul.f32 %v1799_v53, %v2292_v32 }
  0x15   : > { %1881 = vmatpush3.bf16.msra.mxu1 %v2070_v15  ;;  %1842 = vmatprep.subr.bf16.mxu0 %v2071_v16  ;;  %v308_v41 = vadd.f32 %v2298_v36, %v294_v38  ;;  %v309_v42 = vadd.f32 %v2298_v36, %v295_v39  ;;  %v2090_v15 = vld [vmem:[%s2640_s3 + $0x180] sm:$0xff]   ;;  %v2092_v16 = vld [vmem:[%s2640_s3 + $0x1c8] sm:$0xff]  }
  0x16   : > { %1882 = vmatprep.subr.bf16.mxu1 %v2072_v17  ;;  %v310_v62 = vadd.f32 %v2298_v36, %v296_v57  ;;  %v311_v63 = vadd.f32 %v2298_v36, %v297_v58  ;;  %v1830_v57 = vld [vmem:[%s2281_s18 + $0x18] sm:$0xff]  }
  0x17   : > { %v316_v43 = vmax.f32 %v308_v41, 0.0  ;;  %v317_v44 = vmax.f32 %v309_v42, 0.0 }
  0x18   : > { %1843 = vmatpush3.bf16.msra.mxu0 %v2073_v18  ;;  %v318_v6 = vmax.f32 %v310_v62, 0.0  ;;  %v319_v7 = vmax.f32 %v311_v63, 0.0 }
  0x19   : > { %1883 = vmatpush3.bf16.msra.mxu1 %v2074_v19  ;;  %1844 = vmatprep.subr.bf16.mxu0 %v2075_v20  ;;  %v324_v45 = vpack.c.bf16 %v316_v43, %v316_v43  ;;  %v325_v46 = vpack.c.bf16 %v317_v44, %v317_v44  ;;  %v2093_v43 = vld [vmem:[%s2640_s3 + $0x108] sm:$0xff]  }
  0x1a   : > { %1884 = vmatprep.subr.bf16.mxu1 %v2076_v21  ;;  %v326_v12 = vpack.c.bf16 %v318_v6, %v318_v6  ;;  %v327_v17 = vpack.c.bf16 %v319_v7, %v319_v7  ;;  %v1802_v21 = vunpack.c.l.bf16 %v1829_v13  ;;  %v2099_v6 = vld [vmem:[%s2640_s3 + $0x158] sm:$0xff]  }
  0x1b   : > { %v333_v48 = vshrl.u32 %v324_v45, 16  ;;  %v336_v49 = vshll.u32 %v324_v45, 16  ;;  %v340_v50 = vshrl.u32 %v325_v46, 16  ;;  %v343_v51 = vshll.u32 %v325_v46, 16 }
  0x1c   : > { %1845 = vmatpush3.bf16.msra.mxu0 %v2077_v22  ;;  %v347_v19 = vshrl.u32 %v326_v12, 16  ;;  %v350_v20 = vshll.u32 %v326_v12, 16  ;;  %v1806_v12 = vunpack.c.l.bf16 %v1830_v57 }
  0x1d   : > { %1885 = vmatpush3.bf16.msra.mxu1 %v2078_v23  ;;  %1846 = vmatprep.subr.bf16.mxu0 %v2079_v24  ;;  %v335_v54 = vrot.slane %v333_v48, 7  ;;  %v342_v55 = vrot.slane %v340_v50, 7  ;;  %v2089_v24 = vld [vmem:[%s2640_s3 + $0x100] sm:$0xff]   ;;  %v2098_v48 = vld [vmem:[%s2640_s3 + $0x190] sm:$0xff]  }
  0x1e   : > { %1886 = vmatprep.subr.bf16.mxu1 %v2080_v25  ;;  %v354_v25 = vshrl.u32 %v327_v17, 16 }
  0x1f   : > { %v338_v59 = vor.u32 %v336_v49, %v335_v54  ;;  %v345_v60 = vor.u32 %v343_v51, %v342_v55 }
  0x20   : > { %1847 = vmatpush3.bf16.msra.mxu0 %v2081_v26  ;;  %v357_v26 = vshll.u32 %v327_v17, 16  ;;  %v356_v35 = vrot.slane %v354_v25, 7 }
  0x21   : > { %1887 = vmatpush3.bf16.msra.mxu1 %v2082_v27  ;;  %1848 = vmatprep.subr.bf16.mxu0 %v2083_v28  ;;  %v399_v0 = vsel %vm2311_vm4, 0, %v338_v59  ;;  %v400_v1 = vsel %vm2311_vm4, 0, %v345_v60  ;;  %v2091_v28 = vld [vmem:[%s2640_s3 + $0x148] sm:$0xff]   ;;  %v2100_v60 = vld [vmem:[%s2640_s3 + $0x1d8] sm:$0xff]  }
  0x22   : > { %1888 = vmatprep.subr.bf16.mxu1 %v2084_v29  ;;  %v2333_v4 = vsel %vm2318_vm5, %v399_v0, 0  ;;  %v2337_v5 = vsel %vm2318_vm5, %v400_v1, 0  ;;  %v2094_v29 = vld [vmem:[%s2640_s3 + $0x188] sm:$0xff]   ;;  %v359_v44 = vor.u32 %v357_v26, %v356_v35  ;;  %v2097_v1 = vld [vmem:[%s2640_s3 + $0x110] sm:$0xff]  }
  0x23   : > { %v426_v8 = vshrl.u32 %v2333_v4, 16  ;;  %v428_v9 = vshll.u32 %v2333_v4, 16  ;;  %v1676_v10 = vcombine.low %v2333_v4, %v2337_v5  ;;  %v483_v11 = vrot.slane %v2333_v4, 1 }
  0x24   : > { %1849 = vmatpush3.bf16.msra.mxu0 %v2085_v30  ;;  %v435_v23 = vshll.u32 %v2337_v5, 16  ;;  %v1673_v27 = vcombine.low %v2135_v2, %v2333_v4  ;;  %v349_v30 = vrot.slane %v347_v19, 7  ;;  %v433_v41 = vshrl.u32 %v2337_v5, 16 }
  0x25   : > { %1889 = vmatpush3.bf16.msra.mxu1 %v2086_v31  ;;  %1914 = vmatprep.subr.bf16.mxu0 %v2087_v37  ;;  %v430_v14 = vrot.slane %v428_v9, 1  ;;  %v1675_v18 = vcombine.low %v2329_v3, %v483_v11  ;;  %v298_v31 = vmul.f32 %v1802_v21, %v2292_v32  ;;  %v2096_v37 = vld [vmem:[%s2640_s3 + $0x1d0] sm:$0xff]   ;;  %v484_v46 = vrot.slane %v2337_v5, 1 }
  0x26   : > { %1954 = vmatprep.subr.bf16.mxu1 %v2088_v40  ;;  %1253 = vmatprep.mubr.bf16.mxu1 %v1676_v10  ;;  %v352_v38 = vor.u32 %v350_v20, %v349_v30  ;;  %v299_v40 = vmul.f32 %v1803_v33, %v2292_v32  ;;  %v437_v42 = vrot.slane %v435_v23, 1  ;;  %v402_v52 = vsel %vm2311_vm4, 0, %v359_v44 }
  0x27   : > { %v2354_v22 = vor.u32 %v430_v14, %v426_v8  ;;  %v312_v39 = vadd.f32 %v2298_v36, %v298_v31  ;;  %v2400_v55 = vsel %vm2318_vm5, %v402_v52, 0  ;;  %v2102_v14 = vld [vmem:[%s2640_s3 + $0x198] sm:$0xff]   ;;  %v300_v21 = vmul.f32 %v1806_v12, %v2292_v32 }
  0x28   : > { %1254 = vmatmul.mubr.bf16.vlgmr.msra.gmra.mrb[0].mxu1 %v1675_v18  ;;  %v401_v45 = vsel %vm2311_vm4, 0, %v352_v38  ;;  %v313_v50 = vadd.f32 %v2298_v36, %v299_v40  ;;  %v2409_v63 = vor.u32 %v437_v42, %v433_v41  ;;  %v2101_v18 = vld [vmem:[%s2640_s3 + $0x118] sm:$0xff]   ;;  %v449_v20 = vshll.u32 %v2400_v55, 16  ;;  %v2105_v38 = vld [vmem:[%s2640_s3 + $0x120] sm:$0xff]  }
  0x29   : > { %v1674_v34 = vcombine.low %v2329_v3, %v2354_v22  ;;  %1955 = vmatpush3.bf16.msra.mxu1 %v2090_v15  ;;  %v320_v49 = vmax.f32 %v312_v39, 0.0  ;;  %v2392_v51 = vsel %vm2318_vm5, %v401_v45, 0  ;;  %v314_v30 = vadd.f32 %v2298_v36, %v300_v21  ;;  %v2114_v21 = vld [vmem:[%s2640_s3 + $0x1b0] sm:$0xff]  }
  0x2a   : > { %1956 = vmatprep.subr.bf16.mxu1 %v2092_v16  ;;  %v440_v53 = vshrl.u32 %v2392_v51, 16  ;;  %v442_v54 = vshll.u32 %v2392_v51, 16  ;;  %v1682_v58 = vcombine.low %v2392_v51, %v2400_v55  ;;  %v485_v59 = vrot.slane %v2392_v51, 1 }
  0x2b   : > { %1188 = vmatprep.mubr.bf16.mxu0 %v1674_v34  ;;  %v328_v62 = vpack.c.bf16 %v320_v49, %v320_v49  ;;  %v321_v7 = vmax.f32 %v313_v50, 0.0  ;;  %v1807_v16 = vunpack.c.h.bf16 %v1830_v57  ;;  %v2430_v17 = vcombine.low %v2337_v5, %v2392_v51  ;;  %v2121_v5 = vld [vmem:[%s2640_s3 + $0x210] sm:$0xff]  }
  0x2c   : > { %1189 = vmatmul.mubr.bf16.vlgmr.msra.gmra.mrb[0].mxu0 %v1673_v27  ;;  %v444_v0 = vrot.slane %v442_v54, 1  ;;  %1261 = vmatprep.mubr.bf16.mxu1 %v1682_v58  ;;  %v2421_v8 = vcombine.low %v484_v46, %v485_v59  ;;  %v2103_v27 = vld [vmem:[%s2640_s3 + $0x160] sm:$0xff]   ;;  %v486_v34 = vrot.slane %v2400_v55, 1  ;;  %v322_v39 = vmax.f32 %v314_v30, 0.0 }
  0x2d   : > { %1915 = vmatpush3.bf16.msra.mxu0 %v2089_v24  ;;  %1957 = vmatpush3.bf16.msra.mxu1 %v2094_v29  ;;  %v361_v9 = vshrl.u32 %v328_v62, 16  ;;  %v364_v10 = vshll.u32 %v328_v62, 16  ;;  %v329_v15 = vpack.c.bf16 %v321_v7, %v321_v7  ;;  %v447_v24 = vshrl.u32 %v2400_v55, 16  ;;  %v2110_v62 = vld [vmem:[%s2640_s3 + $0x1a8] sm:$0xff]  }
  0x2e   : > { %1916 = vmatprep.subr.bf16.mxu0 %v2091_v28  ;;  %1958 = vmatprep.subr.bf16.mxu1 %v2096_v37  ;;  %v2423_v13 = vor.u32 %v444_v0, %v440_v53  ;;  %v2104_v28 = vld [vmem:[%s2640_s3 + $0x1e0] sm:$0xff]   ;;  %v301_v31 = vmul.f32 %v1807_v16, %v2292_v32  ;;  %v451_v37 = vrot.slane %v449_v20, 1  ;;  %v330_v49 = vpack.c.bf16 %v322_v39, %v322_v39  ;;  %v2118_v39 = vld [vmem:[%s2640_s3 + $0x1b8] sm:$0xff]  }
  0x2f   : > { %v363_v19 = vrot.slane %v361_v9, 7  ;;  %v368_v25 = vshrl.u32 %v329_v15, 16  ;;  %v371_v26 = vshll.u32 %v329_v15, 16  ;;  %v2106_v32 = vld [vmem:[%s2640_s3 + $0x1a0] sm:$0xff]   ;;  %v2111_v9 = vld [vmem:[%s2640_s3 + $0x170] sm:$0xff]   ;;  %v1684_v4 = vcombine.low %v485_v59, %v486_v34 }
  0x30   : > { %1262 = vmatmul.mubr.bf16.gmra.mrb[4].mxu1 %v2421_v8  ;;  %v2440_v23 = vcombine.low %v2409_v63, %v2423_v13  ;;  %v315_v40 = vadd.f32 %v2298_v36, %v301_v31  ;;  %v2107_v36 = vld [vmem:[%s2640_s3 + $0x168] sm:$0xff]   ;;  %v2478_v52 = vor.u32 %v451_v37, %v447_v24  ;;  %v375_v0 = vshrl.u32 %v330_v49, 16  ;;  %v2115_v31 = vld [vmem:[%s2640_s3 + $0x178] sm:$0xff]  }
  0x31   : > { %1917 = vmatpush3.bf16.msra.mxu0 %v2093_v43  ;;  %1959 = vmatpush3.bf16.msra.mxu1 %v2098_v48  ;;  %v366_v29 = vor.u32 %v364_v10, %v363_v19  ;;  %v370_v33 = vrot.slane %v368_v25, 7  ;;  %v2108_v43 = vld [vmem:[%s2640_s3 + $0x1e8] sm:$0xff]   ;;  %v2112_v19 = vld [vmem:[%s2640_s3 + $0x1f0] sm:$0xff]  }
  0x32   : > { %1918 = vmatprep.subr.bf16.mxu0 %v2095_v47  ;;  %1960 = vmatprep.subr.bf16.mxu1 %v2100_v60  ;;  %v323_v50 = vmax.f32 %v315_v40, 0.0  ;;  %v2109_v60 = vld [vmem:[%s2640_s3 + $0x128] sm:$0xff]   ;;  %v377_v12 = vrot.slane %v375_v0, 7  ;;  %v2113_v25 = vld [vmem:[%s2640_s3 + $0x130] sm:$0xff]  }
  0x33   : > { %1196 = vmatprep.mubr.bf16.mxu0 %v2440_v23  ;;  %v403_v35 = vsel %vm2311_vm4, 0, %v366_v29  ;;  %v373_v42 = vor.u32 %v371_v26, %v370_v33  ;;  %v2116_v26 = vld [vmem:[%s2640_s3 + $0x1f8] sm:$0xff]  }
  0x34   : > { %1197 = vmatmul.mubr.bf16.gmra.mrb[4].mxu0 %v2430_v17  ;;  %v2465_v41 = vsel %vm2318_vm5, %v403_v35, 0  ;;  %v331_v7 = vpack.c.bf16 %v323_v50, %v323_v50 }
  0x35   : > { %1919 = vmatpush3.bf16.msra.mxu0 %v2097_v1  ;;  %1961 = vmatpush3.bf16.msra.mxu1 %v2102_v14  ;;  %v454_v44 = vshrl.u32 %v2465_v41, 16  ;;  %v456_v45 = vshll.u32 %v2465_v41, 16  ;;  %v487_v47 = vrot.slane %v2465_v41, 1  ;;  %v404_v48 = vsel %vm2311_vm4, 0, %v373_v42  ;;  %v2117_v42 = vld [vmem:[%s2640_s3 + $0x138] sm:$0xff]  }
  0x36   : > { %1920 = vmatprep.subr.bf16.mxu0 %v2099_v6  ;;  %1962 = vmatprep.subr.bf16.mxu1 %v2104_v28  ;;  %v2482_v54 = vsel %vm2318_vm5, %v404_v48, 0  ;;  %v378_v1 = vshll.u32 %v330_v49, 16  ;;  %v2505_v10 = vcombine.low %v2400_v55, %v2465_v41  ;;  %v382_v16 = vshrl.u32 %v331_v7, 16 }
  0x37   : > { %v458_v53 = vrot.slane %v456_v45, 1  ;;  %v2488_v57 = vcombine.low %v486_v34, %v487_v47  ;;  %v1688_v58 = vcombine.low %v2465_v41, %v2482_v54  ;;  %v463_v14 = vshll.u32 %v2482_v54, 16 }
  0x38   : > { %v380_v20 = vor.u32 %v378_v1, %v377_v12  ;;  %v384_v24 = vrot.slane %v382_v16, 7  ;;  %v461_v28 = vshrl.u32 %v2482_v54, 16  ;;  %v488_v30 = vrot.slane %v2482_v54, 1 }
  0x39   : > { %1921 = vmatpush3.bf16.msra.mxu0 %v2101_v18  ;;  %1963 = vmatpush3.bf16.msra.mxu1 %v2106_v32  ;;  %v2498_v6 = vor.u32 %v458_v53, %v454_v44  ;;  %v385_v18 = vshll.u32 %v331_v7, 16  ;;  %v465_v29 = vrot.slane %v463_v14, 1  ;;  %v1678_v53 = vcombine.low %v483_v11, %v484_v46 }
  0x3a   : > { %1922 = vmatprep.subr.bf16.mxu0 %v2103_v27  ;;  %1964 = vmatprep.subr.bf16.mxu1 %v2108_v43  ;;  %v405_v27 = vsel %vm2311_vm4, 0, %v380_v20  ;;  %v1683_v55 = vcombine.low %v2423_v13, %v2478_v52  ;;  %v1690_v59 = vcombine.low %v487_v47, %v488_v30 }
  0x3b   : > { %1269 = vmatprep.mubr.bf16.mxu1 %v1688_v58  ;;  %v1686_v15 = vcombine.low %v2478_v52, %v2498_v6  ;;  %v2533_v33 = vsel %vm2318_vm5, %v405_v27, 0  ;;  %v387_v35 = vor.u32 %v385_v18, %v384_v24  ;;  %v2546_v43 = vor.u32 %v465_v29, %v461_v28  ;;  %v2125_v52 = vld [vmem:[%s2640_s3 + $0x230] sm:$0xff]  }
  0x3c   : > { %1270 = vmatmul.mubr.bf16.gmra.mrb[8].mxu1 %v2488_v57  ;;  %v468_v37 = vshrl.u32 %v2533_v33, 16  ;;  %v489_v32 = vrot.slane %v2533_v33, 1  ;;  %v1691_v61 = vcombine.low %v2482_v54, %v2533_v33  ;;  %v2120_v54 = vld [vmem:[%s2640_s3 + $0x208] sm:$0xff]   ;;  %v1677_v58 = vcombine.low %v2354_v22, %v2409_v63  ;;  %v2122_v22 = vld [vmem:[%s2640_s3 + $0x218] sm:$0xff]   ;;  %v2123_v63 = vld [vmem:[%s2640_s3 + $0x220] sm:$0xff]  }
  0x3d   : > { %1923 = vmatpush3.bf16.msra.mxu0 %v2105_v38  ;;  %1965 = vmatpush3.bf16.msra.mxu1 %v2110_v62  ;;  %v470_v38 = vshll.u32 %v2533_v33, 16  ;;  %v406_v40 = vsel %vm2311_vm4, 0, %v387_v35  ;;  %v1689_v41 = vcombine.low %v2498_v6, %v2546_v43  ;;  %v2126_v62 = vld [vmem:[%s2640_s3 + $0x238] sm:$0xff]  }
  0x3e   : > { %1924 = vmatprep.subr.bf16.mxu0 %v2107_v36  ;;  %1204 = vmatprep.mubr.bf16.mxu0 %v1686_v15  ;;  %v2550_v45 = vsel %vm2318_vm5, %v406_v40, 0  ;;  %v2554_v36 = vcombine.low %v488_v30, %v489_v32 }
  0x3f   : > { %1205 = vmatmul.mubr.bf16.gmra.mrb[8].mxu0 %v2505_v10  ;;  %1966 = vmatprep.subr.bf16.mxu1 %v2112_v19  ;;  %v472_v44 = vrot.slane %v470_v38, 1  ;;  %v1694_v48 = vcombine.low %v2533_v33, %v2550_v45  ;;  %v493_v11 = vshll.u32 %v2550_v45, 16  ;;  %v491_v46 = vshrl.u32 %v2550_v45, 16 }
  0x40   : > { %v498_v13 = vrot.slane %v2550_v45, 1 }
  0x41   : > { %1925 = vmatpush3.bf16.msra.mxu0 %v2109_v60  ;;  %1967 = vmatpush3.bf16.msra.mxu1 %v2114_v21  ;;  %v2561_v49 = vor.u32 %v472_v44, %v468_v37  ;;  %v495_v51 = vrot.slane %v493_v11, 1  ;;  %v1697_v60 = vcombine.low %v2550_v45, %v2135_v2 }
  0x42   : > { %1926 = vmatprep.subr.bf16.mxu0 %v2111_v9  ;;  %1968 = vmatprep.subr.bf16.mxu1 %v2116_v26  ;;  %v1696_v47 = vcombine.low %v489_v32, %v498_v13  ;;  %v1699_v1 = vcombine.low %v498_v13, %v2329_v3 }
  0x43   : > { %1277 = vmatprep.mubr.bf16.mxu1 %v1694_v48  ;;  %v1692_v50 = vcombine.low %v2546_v43, %v2561_v49 }
  0x44   : > { %1278 = vmatmul.mubr.bf16.gmra.mrb[12].mxu1 %v2554_v36 }
  0x45   : > { %1927 = vmatpush3.bf16.msra.mxu0 %v2113_v25  ;;  %1969 = vmatpush3.bf16.msra.mxu1 %v2118_v39 }
  0x46   : > { %1928 = vmatprep.subr.bf16.mxu0 %v2115_v31  ;;  %1383 = vmatprep.mubr.bf16.mxu1 %v2440_v23  ;;  %v2124_v23 = vld [vmem:[%s2640_s3 + $0x228] sm:$0xff]  }
  0x47   : > { %2030 = vmatprep.subr.bf16.mxu1 %v2119_v56  ;;  %1212 = vmatprep.mubr.bf16.mxu0 %v1692_v50 }
  0x48   : > { %1213 = vmatmul.mubr.bf16.gmra.mrb[12].mxu0 %v1691_v61 }
  0x49   : > { %1929 = vmatpush3.bf16.msra.mxu0 %v2117_v42  ;;  %1318 = vmatprep.mubr.bf16.mxu0 %v1678_v53 }
  0x4a   : > { %2006 = vmatprep.subr.bf16.mxu0 %v2119_v56 }
  0x4c   : > { %1384 = vmatmul.mubr.bf16.vlgmr.msra.gmra.mrb[16].mxu1 %v2430_v17  ;;  %v496_v17 = vor.u32 %v495_v51, %v491_v46 }
  0x4d   : > { %2038 = vmatpush3.bf16.msra.mxu1 %v2119_v56  ;;  %1391 = vmatprep.mubr.bf16.mxu1 %v1686_v15 }
  0x4e   : > { %2031 = vmatprep.subr.bf16.mxu1 %v2120_v54  ;;  %v1698_v34 = vcombine.low %v496_v17, %v2329_v3  ;;  %v1695_v0 = vcombine.low %v2561_v49, %v496_v17 }
  0x50   : > { %1319 = vmatmul.mubr.bf16.vlgmr.msra.gmra.mrb[16].mxu0 %v1677_v58 }
  0x51   : > { %2007 = vmatpush3.bf16.msra.mxu0 %v2119_v56  ;;  %1326 = vmatprep.mubr.bf16.mxu0 %v1684_v4 }
  0x52   : > { %2008 = vmatprep.subr.bf16.mxu0 %v2120_v54  ;;  %2039 = vmatpush3.bf16.msra.mxu1 %v2120_v54 }
  0x53   : > { %2032 = vmatprep.subr.bf16.mxu1 %v2121_v5 }
  0x54   : > { %1392 = vmatmul.mubr.bf16.gmra.mrb[20].mxu1 %v2505_v10 }
  0x55   : > { %2009 = vmatpush3.bf16.msra.mxu0 %v2120_v54  ;;  %1399 = vmatprep.mubr.bf16.mxu1 %v1692_v50 }
  0x56   : > { %2010 = vmatprep.subr.bf16.mxu0 %v2121_v5  ;;  %2040 = vmatpush3.bf16.msra.mxu1 %v2121_v5 }
  0x57   : > { %2033 = vmatprep.subr.bf16.mxu1 %v2122_v22 }
  0x58   : > { %1327 = vmatmul.mubr.bf16.gmra.mrb[20].mxu0 %v1683_v55 }
  0x59   : > { %2011 = vmatpush3.bf16.msra.mxu0 %v2121_v5  ;;  %1334 = vmatprep.mubr.bf16.mxu0 %v1690_v59 }
  0x5a   : > { %2012 = vmatprep.subr.bf16.mxu0 %v2122_v22  ;;  %2041 = vmatpush3.bf16.msra.mxu1 %v2122_v22 }
  0x5b   : > { %2034 = vmatprep.subr.bf16.mxu1 %v2123_v63 }
  0x5c   : > { %1400 = vmatmul.mubr.bf16.gmra.mrb[24].mxu1 %v1691_v61 }
  0x5d   : > { %2013 = vmatpush3.bf16.msra.mxu0 %v2122_v22  ;;  %1407 = vmatprep.mubr.bf16.mxu1 %v1698_v34 }
  0x5e   : > { %2014 = vmatprep.subr.bf16.mxu0 %v2123_v63  ;;  %2042 = vmatpush3.bf16.msra.mxu1 %v2123_v63 }
  0x5f   : > { %2035 = vmatprep.subr.bf16.mxu1 %v2124_v23 }
  0x60   : > { %1335 = vmatmul.mubr.bf16.gmra.mrb[24].mxu0 %v1689_v41 }
  0x61   : > { %2015 = vmatpush3.bf16.msra.mxu0 %v2123_v63  ;;  %1342 = vmatprep.mubr.bf16.mxu0 %v1696_v47 }
  0x62   : > { %2016 = vmatprep.subr.bf16.mxu0 %v2124_v23  ;;  %2043 = vmatpush3.bf16.msra.mxu1 %v2124_v23 }
  0x63   : > { %2036 = vmatprep.subr.bf16.mxu1 %v2125_v52 }
  0x64   : > { %1408 = vmatmul.mubr.bf16.gmra.mrb[28].mxu1 %v1697_v60 }
  0x65   : > { %2017 = vmatpush3.bf16.msra.mxu0 %v2124_v23  ;;  %2026 = vmatprep.mubr.bf16.mxu1 %v2554_v36 }
  0x66   : > { %2018 = vmatprep.subr.bf16.mxu0 %v2125_v52  ;;  %2044 = vmatpush3.bf16.msra.mxu1 %v2125_v52 }
  0x67   : > { %2037 = vmatprep.subr.bf16.mxu1 %v2126_v62 }
  0x68   : > { %1343 = vmatmul.mubr.bf16.gmra.mrb[28].mxu0 %v1695_v0 }
  0x69   : > { %2019 = vmatpush3.bf16.msra.mxu0 %v2125_v52  ;;  %2022 = vmatprep.mubr.bf16.mxu0 %v2421_v8 }
  0x6a   : > { %2020 = vmatprep.subr.bf16.mxu0 %v2126_v62  ;;  %2045 = vmatpush3.bf16.msra.mxu1 %v2126_v62 }
  0x6d   : > { %2021 = vmatpush3.bf16.msra.mxu0 %v2126_v62  ;;  %2027 = vmatmul.mubr.bf16.vlgmr.msra.gmra.mrb[32].mxu1 %v1699_v1 }
  0x70   : > { %2023 = vmatmul.mubr.bf16.vlgmr.msra.gmra.mrb[32].mxu0 %v2488_v57 }
  0xfb   : > { %v1890_v2 = vpop.f32.mrb[0].mxu1 }
  0xfc   : > { %v1891_v6 = vpop.f32.mrb[1].mxu1 }
  0xfd   : > { %v1892_v7 = vadd.f32 %v1891_v6, %v1890_v2  ;;  %v1893_v9 = vpop.f32.mrb[2].mxu1 }
  0xfe   : > { %v1894_v10 = vpop.f32.mrb[3].mxu1 }
  0xff   : > { %v1850_v12 = vpop.f32.mrb[0].mxu0  ;;  %v1895_v14 = vadd.f32 %v1894_v10, %v1893_v9 }
 0x100   : > { %v1851_v15 = vpop.f32.mrb[1].mxu0 }
 0x101   : > { %v1852_v16 = vadd.f32 %v1851_v15, %v1850_v12  ;;  %v1853_v18 = vpop.f32.mrb[2].mxu0 }
 0x102   : > { %v1854_v3 = vpop.f32.mrb[3].mxu0 }
 0x103   : > { %v1256_v19 = vadd.f32 %v1892_v7, %v1852_v16  ;;  %v1855_v20 = vadd.f32 %v1854_v3, %v1853_v18  ;;  %v1896_v21 = vpop.f32.mrb[4].mxu1 }
 0x104   : > { %v1897_v24 = vpop.f32.mrb[5].mxu1 }
 0x105   : > { %v1259_v8 = vadd.f32 %v1895_v14, %v1855_v20  ;;  %v1898_v25 = vadd.f32 %v1897_v24, %v1896_v21  ;;  %v1899_v26 = vpop.f32.mrb[6].mxu1 }
 0x106   : > { %v1900_v27 = vpop.f32.mrb[7].mxu1 }
 0x107   : > { %v1856_v57 = vpop.f32.mrb[4].mxu0  ;;  %v1901_v28 = vadd.f32 %v1900_v27, %v1899_v26 }
 0x108   : > { %v1857_v29 = vpop.f32.mrb[5].mxu0 }
 0x109   : > { %v1858_v30 = vadd.f32 %v1857_v29, %v1856_v57  ;;  %v1859_v31 = vpop.f32.mrb[6].mxu0 }
 0x10a   : > { %v1860_v33 = vpop.f32.mrb[7].mxu0 }
 0x10b   : > { %v1264_v35 = vadd.f32 %v1898_v25, %v1858_v30  ;;  %v1861_v37 = vadd.f32 %v1860_v33, %v1859_v31 }
 0x10d   : > { %v1267_v38 = vadd.f32 %v1901_v28, %v1861_v37 }
 0x10f   : > { %v1902_v32 = vpop.f32.mrb[8].mxu1 }
 0x110   : > { %v1903_v39 = vpop.f32.mrb[9].mxu1 }
 0x111   : > { %v1904_v40 = vadd.f32 %v1903_v39, %v1902_v32  ;;  %v1905_v42 = vpop.f32.mrb[10].mxu1 }
 0x112   : > { %v1862_v43 = vpop.f32.mrb[8].mxu0  ;;  %v1906_v44 = vpop.f32.mrb[11].mxu1 }
 0x113   : > { %v1863_v45 = vpop.f32.mrb[9].mxu0  ;;  %v1907_v36 = vadd.f32 %v1906_v44, %v1905_v42 }
 0x114   : > { %v1864_v56 = vadd.f32 %v1863_v45, %v1862_v43  ;;  %v1865_v48 = vpop.f32.mrb[10].mxu0 }
 0x115   : > { %v1866_v49 = vpop.f32.mrb[11].mxu0 }
 0x116   : > { %v1272_v61 = vadd.f32 %v1904_v40, %v1864_v56  ;;  %v1867_v50 = vadd.f32 %v1866_v49, %v1865_v48 }
 0x117   : > { %v1908_v54 = vpop.f32.mrb[12].mxu1 }
 0x118   : > { %v1275_v53 = vadd.f32 %v1907_v36, %v1867_v50  ;;  %v1909_v58 = vpop.f32.mrb[13].mxu1 }
 0x119   : > { %v1910_v4 = vadd.f32 %v1909_v58, %v1908_v54  ;;  %v1911_v5 = vpop.f32.mrb[14].mxu1 }
 0x11a   : > { %v1912_v22 = vpop.f32.mrb[15].mxu1 }
 0x11b   : > { %v1868_v11 = vpop.f32.mrb[12].mxu0  ;;  %v1913_v51 = vadd.f32 %v1912_v22, %v1911_v5 }
 0x11c   : > { %v1869_v46 = vpop.f32.mrb[13].mxu0 }
 0x11d   : > { %v1870_v55 = vadd.f32 %v1869_v46, %v1868_v11  ;;  %v1871_v59 = vpop.f32.mrb[14].mxu0 }
 0x11e   : > { %v1872_v63 = vpop.f32.mrb[15].mxu0 }
 0x11f   : > { %v1280_v17 = vadd.f32 %v1910_v4, %v1870_v55  ;;  %v1873_v13 = vadd.f32 %v1872_v63, %v1871_v59  ;;  %v1970_v23 = vpop.f32.mrb[16].mxu1 }
 0x120   : > { %v1971_v41 = vpop.f32.mrb[17].mxu1 }
 0x121   : > { %v1283_v34 = vadd.f32 %v1913_v51, %v1873_v13  ;;  %v1972_v47 = vadd.f32 %v1971_v41, %v1970_v23  ;;  %v1973_v52 = vpop.f32.mrb[18].mxu1 }
 0x122   : > { %v1974_v62 = vpop.f32.mrb[19].mxu1 }
 0x123   : > { %v1930_v60 = vpop.f32.mrb[16].mxu0  ;;  %v1975_v1 = vadd.f32 %v1974_v62, %v1973_v52 }
 0x124   : > { %v1931_v0 = vpop.f32.mrb[17].mxu0 }
 0x125   : > { %v1932_v2 = vadd.f32 %v1931_v0, %v1930_v60  ;;  %v1933_v6 = vpop.f32.mrb[18].mxu0 }
 0x126   : > { %v1934_v7 = vpop.f32.mrb[19].mxu0 }
 0x127   : > { %v1321_v9 = vadd.f32 %v1932_v2, %v1256_v19  ;;  %v1935_v10 = vadd.f32 %v1934_v7, %v1933_v6  ;;  %v1976_v12 = vpop.f32.mrb[20].mxu1 }
 0x128   : > { %v1977_v15 = vpop.f32.mrb[21].mxu1 }
 0x129   : > { %v1324_v14 = vadd.f32 %v1935_v10, %v1259_v8  ;;  %v1386_v16 = vadd.f32 %v1972_v47, %v1321_v9  ;;  %v1978_v18 = vadd.f32 %v1977_v15, %v1976_v12  ;;  %v1979_v3 = vpop.f32.mrb[22].mxu1 }
 0x12a   : > { %v1980_v21 = vpop.f32.mrb[23].mxu1 }
 0x12b   : > { %v1936_v20 = vpop.f32.mrb[20].mxu0  ;;  %v1389_v24 = vadd.f32 %v1975_v1, %v1324_v14  ;;  %v1981_v26 = vadd.f32 %v1980_v21, %v1979_v3 }
 0x12c   : > { %v1937_v25 = vpop.f32.mrb[21].mxu0 }
 0x12d   : > { %v1938_v27 = vadd.f32 %v1937_v25, %v1936_v20  ;;  %v1939_v57 = vpop.f32.mrb[22].mxu0 }
 0x12e   : > { %v1940_v28 = vpop.f32.mrb[23].mxu0 }
 0x12f   : > { %v1329_v29 = vadd.f32 %v1938_v27, %v1264_v35  ;;  %v1941_v30 = vadd.f32 %v1940_v28, %v1939_v57  ;;  %v1982_v31 = vpop.f32.mrb[24].mxu1 }
 0x130   : > { %v1983_v19 = vpop.f32.mrb[25].mxu1 }
 0x131   : > { %v1332_v33 = vadd.f32 %v1941_v30, %v1267_v38  ;;  %v1394_v37 = vadd.f32 %v1978_v18, %v1329_v29  ;;  %v1984_v32 = vadd.f32 %v1983_v19, %v1982_v31  ;;  %v1985_v8 = vpop.f32.mrb[26].mxu1 }
 0x132   : > { %v1986_v40 = vpop.f32.mrb[27].mxu1 }
 0x133   : > { %v1942_v39 = vpop.f32.mrb[24].mxu0  ;;  %v1397_v42 = vadd.f32 %v1981_v26, %v1332_v33  ;;  %v1987_v44 = vadd.f32 %v1986_v40, %v1985_v8 }
 0x134   : > { %v1943_v43 = vpop.f32.mrb[25].mxu0 }
 0x135   : > { %v1944_v45 = vadd.f32 %v1943_v43, %v1942_v39  ;;  %v1945_v36 = vpop.f32.mrb[26].mxu0 }
 0x136   : > { %v1946_v56 = vpop.f32.mrb[27].mxu0 }
 0x137   : > { %v1337_v48 = vadd.f32 %v1944_v45, %v1272_v61  ;;  %v1947_v49 = vadd.f32 %v1946_v56, %v1945_v36  ;;  %v1988_v50 = vpop.f32.mrb[28].mxu1 }
 0x138   : > { %v1989_v35 = vpop.f32.mrb[29].mxu1 }
 0x139   : > { %v1340_v54 = vadd.f32 %v1947_v49, %v1275_v53  ;;  %v1402_v58 = vadd.f32 %v1984_v32, %v1337_v48  ;;  %v1990_v4 = vadd.f32 %v1989_v35, %v1988_v50  ;;  %v1991_v38 = vpop.f32.mrb[30].mxu1 }
 0x13a   : > { %v1992_v11 = vpop.f32.mrb[31].mxu1 }
 0x13b   : > { %v1948_v5 = vpop.f32.mrb[28].mxu0  ;;  %v1405_v22 = vadd.f32 %v1987_v44, %v1340_v54  ;;  %v1993_v51 = vadd.f32 %v1992_v11, %v1991_v38 }
 0x13c   : > { %v1949_v46 = vpop.f32.mrb[29].mxu0 }
 0x13d   : > { %v1950_v55 = vadd.f32 %v1949_v46, %v1948_v5  ;;  %v1951_v59 = vpop.f32.mrb[30].mxu0 }
 0x13e   : > { %v1952_v63 = vpop.f32.mrb[31].mxu0 }
 0x13f   : > { %v1345_v13 = vadd.f32 %v1950_v55, %v1280_v17  ;;  %v1953_v23 = vadd.f32 %v1952_v63, %v1951_v59 }
 0x140   : > { %v2028_v41 = vpop.f32.mrb[32].mxu1 }
 0x141   : > { %v1348_v61 = vadd.f32 %v1953_v23, %v1283_v34  ;;  %v1410_v47 = vadd.f32 %v1990_v4, %v1345_v13  ;;  %v1466_v52 = vpop.f32.mrb[33].mxu1 }
 0x142   : > { %v1467_v53 = vadd.f32 %v1466_v52, %v1402_v58  ;;  %v2029_v60 = vpop.f32.mrb[34].mxu1 }
 0x143   : > { %v2024_v62 = vpop.f32.mrb[32].mxu0  ;;  %v1475_v0 = vadd.f32 %v2028_v41, %v1410_v47  ;;  %v1413_v1 = vadd.f32 %v1993_v51, %v1348_v61  ;;  %v1469_v2 = vpop.f32.mrb[35].mxu1 }
 0x144   : > { %v1459_v6 = vadd.f32 %v2024_v62, %v1394_v37  ;;  %v1450_v7 = vpop.f32.mrb[33].mxu0  ;;  %v1470_v9 = vadd.f32 %v1469_v2, %v1405_v22  ;;  %v1539_v33 = vmul.f32 %v1467_v53, %v1467_v53 }
 0x145   : > { %v1451_v10 = vadd.f32 %v1450_v7, %v1386_v16  ;;  %v2025_v17 = vpop.f32.mrb[34].mxu0  ;;  %v1478_v12 = vadd.f32 %v2029_v60, %v1413_v1  ;;  %v1541_v39 = vmul.f32 %v1475_v0, %v1475_v0 }
 0x146   : > { %v1462_v34 = vadd.f32 %v2025_v17, %v1397_v42  ;;  %v1453_v14 = vpop.f32.mrb[35].mxu0  ;;  %v1821_v15 = vpack.c.bf16 %v1470_v9, %v1467_v53  ;;  %v1537_v16 = vmul.f32 %v1459_v6, %v1459_v6 }
 0x147   : > { %v1826_v18 = vpack.c.bf16 %v1478_v12, %v1475_v0  ;;  %v1454_v3 = vadd.f32 %v1453_v14, %v1389_v24  ;;  %v1535_v21 = vmul.f32 %v1451_v10, %v1451_v10  ;;  %v1540_v24 = vmul.f32 %v1470_v9, %v1470_v9 }
 0x148   : > { %v1816_v20 = vpack.c.bf16 %v1462_v34, %v1459_v6  ;;  %1832 = vst [vmem:[%s262_s28 + $0x10] sm:$0xff] %v1821_v15   ;;  %v1538_v29 = vmul.f32 %v1462_v34, %v1462_v34  ;;  %v1542_v43 = vmul.f32 %v1478_v12, %v1478_v12 }
 0x149   : > { %1833 = vst [vmem:[%s262_s28 + $0x18] sm:$0xff] %v1826_v18   ;;  %v1811_v25 = vpack.c.bf16 %v1454_v3, %v1451_v10  ;;  %v1521_v26 = vadd.f32 %v1454_v3, %v1451_v10  ;;  %v1536_v27 = vmul.f32 %v1454_v3, %v1454_v3 }
 0x14a   : > { %1831 = vst [vmem:[%s262_s28 + $0x8] sm:$0xff] %v1816_v20  }
 0x14b   : > { %1812 = vst [vmem:[%s262_s28] sm:$0xff] %v1811_v25   ;;  %v1522_v57 = vadd.f32 %v1521_v26, %v1459_v6  ;;  %v1543_v28 = vadd.f32 %v1536_v27, %v1535_v21 }
 0x14d   : > { %v1544_v30 = vadd.f32 %v1543_v28, %v1537_v16  ;;  %v1523_v31 = vadd.f32 %v1522_v57, %v1462_v34 }
 0x14f   : > { %v1524_v19 = vadd.f32 %v1523_v31, %v1467_v53  ;;  %v1545_v37 = vadd.f32 %v1544_v30, %v1538_v29 }
 0x151   : > { %v1525_v32 = vadd.f32 %v1524_v19, %v1470_v9  ;;  %v1546_v8 = vadd.f32 %v1545_v37, %v1539_v33 }
 0x153   : > { %v1526_v40 = vadd.f32 %v1525_v32, %v1475_v0  ;;  %v1547_v42 = vadd.f32 %v1546_v8, %v1540_v24 }
 0x155   : > { %v1527_v44 = vadd.f32 %v1526_v40, %v1478_v12  ;;  %v1548_v45 = vadd.f32 %v1547_v42, %v1541_v39 }
 0x157   : > { %v1528_v36 = vrot.slane %v1527_v44, 4  ;;  %v1549_v56 = vadd.f32 %v1548_v45, %v1542_v43 }
 0x159   : > { %v1529_v48 = vadd.f32 %v1528_v36, %v1527_v44  ;;  %v1550_v49 = vrot.slane %v1549_v56, 4 }
 0x15b   : > { %v1530_v50 = vrot.slane %v1529_v48, 2  ;;  %v1551_v54 = vadd.f32 %v1550_v49, %v1549_v56 }
 0x15d   : > { %v1531_v35 = vadd.f32 %v1530_v50, %v1529_v48  ;;  %v1552_v58 = vrot.slane %v1551_v54, 2 }
 0x15f   : > { %v1532_v4 = vrot.slane %v1531_v35, 1  ;;  %v1553_v38 = vadd.f32 %v1552_v58, %v1551_v54 }
 0x161   : > { %v1533_v5 = vadd.f32 %v1532_v4, %v1531_v35  ;;  %v1554_v11 = vrot.slane %v1553_v38, 1 }
 0x163   : > { %1534 = vst [vmem:[%s265_s30] sm:$0x1] %v1533_v5  ;;  %v1555_v22 = vadd.f32 %v1554_v11, %v1553_v38 }
 0x165   : > { %1556 = vst [vmem:[%s268_s10] sm:$0x1] %v1555_v22 }
 0x166 PF: > { %s17_s21 = sadd.s32 1, %s2133_s21  }
 0x167   : > { %p14_p4 = scmp.ge.s32.totalorder %s17_s21, 4  }
 0x169   :  { %16 = sbr.rel (!%p14_p4) target bundleno = 1 (0x1), region = 90 }

</bundles_post_ra>
